<compile_context>
chip_gen: v5e
topology: v5e:2x2
jax: 0.10.0
libtpu: 0.0.40
codegen_flags: <defaults>
</compile_context>

<pallas_src>
import jax
import jax.numpy as jnp
from jax.experimental import pallas as pl
from jax.experimental.pallas import tpu as pltpu

NFEAT = 32            # density feature width
HIDDEN = 32           # MLP hidden width
NSPECIES = 2
ALPHA = 1.0
PAD_VAL = -1e10       # same padding sentinel the torch code tests against
BLOCK_MOL = 8         # molecules per outer grid step; sweep up (32-64) on
                      # v5e/v6e (128 MiB VMEM), keep ~half on v7x (64 MiB).
MAX_PAIR_TILE = 1024  # pairs per inner grid step (bounds the (tile, an) one-hots)
OUT_LANES = 128       # lane-dense output slab; dipole lives in lanes 0..2


# ------------------------------------------------------------ fused kernel --
def fused_property_kernel(pair_ref, atom_ref, centers_ref, spbias_ref,
                          w1_ref, w2_ref, b2_ref, out_ref,
                          dens_acc, sj_acc):
    f32 = jnp.float32
    pt = pl.program_id(1)
    last_pt = pl.num_programs(1) - 1

    atom = atom_ref[...]                      # (an, 4): x, y, z, species
    pair = pair_ref[...]                      # (tp, 5): idx_i, idx_j, sx, sy, sz
    an = atom.shape[0]
    tp = pair.shape[0]
    bm = out_ref.shape[0]
    natom = an // bm
    nspecies = spbias_ref.shape[0]

    cart = atom[:, 0:3]                       # (an, 3)
    idx_i = pair[:, 0:1].astype(jnp.int32)    # block-local flat atom ids (exact in f32)
    idx_j = pair[:, 1:2].astype(jnp.int32)
    shifts = pair[:, 2:5]                     # (tp, 3)

    @pl.when(pt == 0)
    def _():
        dens_acc[...] = jnp.zeros_like(dens_acc)
        sj_acc[...] = jnp.zeros_like(sj_acc)

    # one-hot gather/scatter matrices for this pair tile
    atom_iota = jax.lax.broadcasted_iota(jnp.int32, (tp, an), 1)
    oh_i = (idx_i == atom_iota).astype(f32)   # (tp, an)
    oh_j = (idx_j == atom_iota).astype(f32)

    # valid-pair mask (torch padding_mask); dvec masked before squaring so the
    # -1e10 shift sentinel never enters the arithmetic.
    valid = (jnp.min(shifts, axis=1, keepdims=True) > PAD_VAL).astype(f32)

    # fused gather: one (tp,an)x(an,3) matmul instead of two
    dvec = (jnp.dot(oh_i - oh_j, cart, preferred_element_type=f32) + shifts) * valid

    # --- density ------------------------------------------------------------
    # TODO(synk): real REANN GetDensity (orbital expansion + recursive
    # embedding) is an external module; deterministic RBF stand-in here.
    r = jnp.sqrt(jnp.sum(dvec * dvec, axis=1, keepdims=True))      # (tp, 1)
    rbf = jnp.exp(-ALPHA * (r - centers_ref[...]) ** 2) * valid    # (tp, NFEAT)

    # scatter-add onto the center atom / per-atom neighbor-vector sum,
    # accumulated across pair tiles.
    dens_acc[...] += jax.lax.dot_general(oh_i, rbf, (((0,), (0,)), ((), ())),
                                         preferred_element_type=f32)  # (an, NFEAT)
    sj_acc[...] += jax.lax.dot_general(oh_j, dvec, (((0,), (0,)), ((), ())),
                                       preferred_element_type=f32)    # (an, 3)

    # --- finalize: MLP + dipole (runs once per molecule block) ---------------
    @pl.when(pt == last_pt)
    def _():
        # species one-hot -> folded (emb @ w1 + b1) bias
        sp = atom[:, 3:4].astype(jnp.int32)
        sp_iota = jax.lax.broadcasted_iota(jnp.int32, (an, nspecies), 1)
        oh_sp = (sp == sp_iota).astype(f32)

        # TODO(synk): REANN's NNMod uses one MLP per element type; shared MLP
        # with a species bias is kept as the deterministic stand-in.
        h = jnp.tanh(jnp.dot(dens_acc[...], w1_ref[...], preferred_element_type=f32)
                     + jnp.dot(oh_sp, spbias_ref[...], preferred_element_type=f32))
        # final 1-wide projection as VPU multiply + lane reduction (no 1-column
        # MXU matmul); per-atom output never leaves VMEM.
        out_atom = jnp.sum(h * w2_ref[...], axis=1, keepdims=True) + b2_ref[...]

        # dipole: sum over pairs of out_atom[j]*dvec == per-atom contraction
        contrib = out_atom * sj_acc[...]                              # (an, 3)

        # molecule reduction: atoms of a molecule are contiguous in the block;
        # tiny (an, bm) atom->molecule map (== reshape(bm,natom,3).sum(axis=1)).
        row = jax.lax.broadcasted_iota(jnp.int32, (an, bm), 0)
        col = jax.lax.broadcasted_iota(jnp.int32, (an, bm), 1)
        d = row - col * natom
        mol_map = ((d >= 0) & (d < natom)).astype(f32)                # (an, bm)
        per_mol = jax.lax.dot_general(mol_map, contrib, (((0,), (0,)), ((), ())),
                                      preferred_element_type=f32)     # (bm, 3)

        # lane-dense (bm, 128) store: dipole in lanes 0..2, zeros elsewhere
        lane = jax.lax.broadcasted_iota(jnp.int32, (bm, OUT_LANES), 1)
        tile = jnp.where(lane == 0, per_mol[:, 0:1],
               jnp.where(lane == 1, per_mol[:, 1:2],
               jnp.where(lane == 2, per_mol[:, 2:3], 0.0)))
        out_ref[...] = tile


# ----------------------------------------------------------------- helpers --
def _pair_tile(pn, target):
    """Largest divisor of pn that is <= target and a multiple of 8."""
    if pn <= target:
        return pn
    for d in range(target, 7, -1):
        if pn % d == 0 and d % 8 == 0:
            return d
    return pn


def _vmem_limit_bytes():
    try:
        cap = pltpu.get_tpu_info().vmem_capacity_bytes
        return min(int(cap * 0.75), 100 * 1024 * 1024)   # ~48 MiB v7x, 96-100 MiB v5e/v6e
    except Exception:
        return 48 * 1024 * 1024


# ---------------------------------------------------------- Property.forward --
def property_forward(cart, numatoms, species, atom_index_t, shifts, params,
                     block_mol=BLOCK_MOL, max_pair_tile=MAX_PAIR_TILE):
    del numatoms  # only its shape is used in the torch code (== nmol)
    nmol, natom, _ = cart.shape
    npairs = atom_index_t.shape[2]
    nfeat = params["centers"].shape[1]
    hidden = params["w1"].shape[1]
    nspecies = params["emb"].shape[0]

    bm = block_mol
    nmol_pad = ((nmol + bm - 1) // bm) * bm
    pad = nmol_pad - nmol

    cart_p = jnp.pad(cart, ((0, pad), (0, 0), (0, 0)))
    species_p = jnp.pad(species, ((0, pad), (0, 0)))
    # padded molecules: every pair marked invalid via the shift sentinel
    shifts_p = jnp.pad(shifts, ((0, pad), (0, 0), (0, 0)), constant_values=PAD_VAL)
    ai_p = jnp.pad(atom_index_t, ((0, 0), (0, pad), (0, 0)))

    # block-local flattened indices (torch's self_mol_index trick, relative to
    # each BLOCK_MOL-molecule block)
    offs = (jnp.arange(nmol_pad, dtype=jnp.int32) % bm) * natom
    idx_i = (ai_p[0].astype(jnp.int32) + offs[:, None]).astype(jnp.float32)
    idx_j = (ai_p[1].astype(jnp.int32) + offs[:, None]).astype(jnp.float32)

    # lane-packed input slabs: one per-pair stream, one per-atom stream
    # (indices / species stored as exact small floats; unpacked in-kernel)
    pair_data = jnp.concatenate(
        [idx_i[..., None], idx_j[..., None], shifts_p], axis=-1
    ).reshape(nmol_pad * npairs, 5)
    atom_data = jnp.concatenate(
        [cart_p, species_p[..., None].astype(jnp.float32)], axis=-1
    ).reshape(nmol_pad * natom, 4)

    # fold the species embedding through the first layer: emb @ w1 + b1
    spbias = params["emb"] @ params["w1"] + params["b1"]       # (nspecies, hidden)

    num_blocks = nmol_pad // bm
    an = bm * natom
    pn = bm * npairs
    tp = _pair_tile(pn, max_pair_tile)
    npt = pn // tp

    flops_block = (2 * pn * an * 3              # dvec gather
                   + 2 * pn * an * nfeat        # density scatter
                   + 2 * pn * an * 3            # S_j contraction
                   + 2 * an * nfeat * hidden    # MLP layer 1
                   + 2 * an * nspecies * hidden # species bias
                   + 2 * an * hidden)           # projection
    cost = pl.CostEstimate(
        flops=flops_block * num_blocks,
        transcendentals=(pn * nfeat + pn + an * hidden) * num_blocks,
        bytes_accessed=int(pair_data.size * 4 + atom_data.size * 4
                           + nmol_pad * OUT_LANES * 4
                           + (nfeat * hidden + nspecies * hidden
                              + nfeat + hidden + 1) * 4),
    )

    out = pl.pallas_call(
        fused_property_kernel,
        out_shape=jax.ShapeDtypeStruct((nmol_pad, OUT_LANES), jnp.float32),
        grid_spec=pltpu.PrefetchScalarGridSpec(
            num_scalar_prefetch=0,
            grid=(num_blocks, npt),               # reduction (pairs) axis last
            in_specs=[
                pl.BlockSpec((tp, 5), lambda b, t: (b * npt + t, 0)),   # pair slab
                pl.BlockSpec((an, 4), lambda b, t: (b, 0)),             # atom slab
                pl.BlockSpec((1, nfeat), lambda b, t: (0, 0)),          # centers
                pl.BlockSpec((nspecies, hidden), lambda b, t: (0, 0)),  # emb@w1+b1
                pl.BlockSpec((nfeat, hidden), lambda b, t: (0, 0)),     # w1
                pl.BlockSpec((1, hidden), lambda b, t: (0, 0)),         # w2 (row)
                pl.BlockSpec((1, 1), lambda b, t: (0, 0)),              # b2
            ],
            out_specs=pl.BlockSpec((bm, OUT_LANES), lambda b, t: (b, 0)),
            scratch_shapes=[pltpu.VMEM((an, nfeat), jnp.float32),       # density acc
                            pltpu.VMEM((an, 3), jnp.float32)],          # S_j acc
        ),
        compiler_params=pltpu.CompilerParams(
            dimension_semantics=("parallel", "arbitrary"),
            vmem_limit_bytes=_vmem_limit_bytes()),
        cost_estimate=cost,
    )(pair_data, atom_data, params["centers"], spbias,
      params["w1"], params["w2"], params["b2"])

    return (out[:nmol, :3],)


# ---------------------------------------------------- pure-JAX reference path --
def reference_forward(cart, numatoms, species, atom_index_t, shifts, params):
    del numatoms
    nmol, natom, _ = cart.shape
    npairs = atom_index_t.shape[2]
    centers = params["centers"]

    def dens_one(cart_m, idx_m, shift_m):
        ci = cart_m[idx_m[0]]
        cj = cart_m[idx_m[1]]
        valid = (jnp.min(shift_m, axis=1, keepdims=True) > PAD_VAL).astype(jnp.float32)
        dvec = (ci - cj + shift_m) * valid
        r = jnp.sqrt(jnp.sum(dvec * dvec, axis=1, keepdims=True))
        rbf = jnp.exp(-ALPHA * (r - centers) ** 2) * valid
        return jnp.zeros((natom, NFEAT), jnp.float32).at[idx_m[0]].add(rbf)

    dens = jax.vmap(dens_one, in_axes=(0, 1, 0))(cart, atom_index_t, shifts)
    dens_flat = dens.reshape(-1, NFEAT) + params["emb"][species.reshape(-1)]
    h = jnp.tanh(dens_flat @ params["w1"] + params["b1"])
    output = (jnp.sum(h * params["w2"], axis=1, keepdims=True)
              + params["b2"]).reshape(-1)

    # torch-style flattened dipole path
    tmp_index = jnp.arange(nmol) * natom
    self_mol_index = jnp.repeat(tmp_index, npairs)
    cart_flat = cart.reshape(-1, 3)
    shifts_flat = shifts.reshape(-1, 3)
    valid = (shifts_flat > PAD_VAL).all(axis=1).astype(jnp.float32)[:, None]
    ai12 = atom_index_t.reshape(2, -1) + self_mol_index[None, :]
    dvec = (cart_flat[ai12[0]] - cart_flat[ai12[1]] + shifts_flat) * valid
    dip = output[ai12[1]][:, None] * dvec
    tot = jnp.zeros((nmol * natom, 3), jnp.float32).at[ai12[0]].add(dip)
    return (tot.reshape(nmol, natom, 3).sum(axis=1),)


if __name__ == "__main__":
    key = jax.random.PRNGKey(0)
    nmol, natom, npairs = 2, 8, 16
    k = jax.random.split(key, 10)

    cart = jax.random.normal(k[0], (nmol, natom, 3), jnp.float32) * 2.0
    species = jax.random.randint(k[1], (nmol, natom), 0, NSPECIES)
    numatoms = jnp.full((nmol,), natom, jnp.int32)
    idx_i = jax.random.randint(k[2], (nmol, npairs), 0, natom)
    idx_j = jax.random.randint(k[3], (nmol, npairs), 0, natom)
    atom_index_t = jnp.stack([idx_i, idx_j], axis=0).astype(jnp.int32)  # (2,nmol,npairs)
    shifts = jnp.zeros((nmol, npairs, 3), jnp.float32)
    pad_mask = jnp.arange(npairs) >= npairs - 4                          # last 4 pairs padded
    shifts = jnp.where(pad_mask[None, :, None], PAD_VAL, shifts)

    params = {
        "centers": jnp.linspace(0.5, 4.0, NFEAT, dtype=jnp.float32).reshape(1, NFEAT),
        "emb": jax.random.normal(k[4], (NSPECIES, NFEAT), jnp.float32) * 0.1,
        "w1": jax.random.normal(k[5], (NFEAT, HIDDEN), jnp.float32) * 0.1,
        "b1": jax.random.normal(k[6], (1, HIDDEN), jnp.float32) * 0.1,
        "w2": jax.random.normal(k[7], (1, HIDDEN), jnp.float32) * 0.1,
        "b2": jax.random.normal(k[8], (1, 1), jnp.float32) * 0.1,
    }

    (res,) = property_forward(cart, numatoms, species, atom_index_t, shifts, params)
    res = jax.block_until_ready(res)
    (ref,) = reference_forward(cart, numatoms, species, atom_index_t, shifts, params)

    assert res.shape == (nmol, 3), res.shape
    assert jnp.allclose(res, ref, atol=2e-3, rtol=2e-3), (res, ref)
    print("KERNEL_OK")
</pallas_src>

<mosaic_0001>
module attributes {stable_mosaic.version = 11 : i64} {
  func.func @fused_property_kernel(%arg0: i32, %arg1: i32, %arg2: memref<128x5xf32, #tpu.memory_space<vmem>>, %arg3: memref<64x4xf32, #tpu.memory_space<vmem>>, %arg4: memref<1x32xf32, #tpu.memory_space<vmem>>, %arg5: memref<2x32xf32, #tpu.memory_space<vmem>>, %arg6: memref<32x32xf32, #tpu.memory_space<vmem>>, %arg7: memref<1x32xf32, #tpu.memory_space<vmem>>, %arg8: memref<1x1xf32, #tpu.memory_space<vmem>>, %arg9: memref<8x128xf32, #tpu.memory_space<vmem>>, %arg10: memref<64x32xf32, #tpu.memory_space<vmem>>, %arg11: memref<64x3xf32, #tpu.memory_space<vmem>>) attributes {dimension_semantics = [#tpu.dimension_semantics<parallel>, #tpu.dimension_semantics<arbitrary>], iteration_bounds = array<i64: 1, 1>, scalar_prefetch = 0 : i64, scratch_operands = 2 : i64, tpu.core_type = #tpu.core_type<tc>, window_params = [{transform_indices = @transform_0, window_bounds = array<i64: 128, 5>}, {transform_indices = @transform_1, window_bounds = array<i64: 64, 4>}, {pipeline_mode = #tpu.pipeline_mode<synchronous>, transform_indices = @transform_2, window_bounds = array<i64: 1, 32>}, {pipeline_mode = #tpu.pipeline_mode<synchronous>, transform_indices = @transform_3, window_bounds = array<i64: 2, 32>}, {pipeline_mode = #tpu.pipeline_mode<synchronous>, transform_indices = @transform_4, window_bounds = array<i64: 32, 32>}, {pipeline_mode = #tpu.pipeline_mode<synchronous>, transform_indices = @transform_5, window_bounds = array<i64: 1, 32>}, {pipeline_mode = #tpu.pipeline_mode<synchronous>, transform_indices = @transform_6, window_bounds = array<i64: 1, 1>}, {transform_indices = @transform_7, window_bounds = array<i64: 8, 128>}]} {
    %c0 = arith.constant 0 : index
    %c0_0 = arith.constant 0 : index
    %0 = vector.load %arg3[%c0, %c0_0] : memref<64x4xf32, #tpu.memory_space<vmem>>, vector<64x4xf32>
    %c0_1 = arith.constant 0 : index
    %c0_2 = arith.constant 0 : index
    %1 = vector.load %arg2[%c0_1, %c0_2] : memref<128x5xf32, #tpu.memory_space<vmem>>, vector<128x5xf32>
    %2 = vector.extract_strided_slice %0 {offsets = [0, 0], sizes = [64, 3], strides = [1, 1]} : vector<64x4xf32> to vector<64x3xf32>
    %3 = vector.extract_strided_slice %1 {offsets = [0, 0], sizes = [128, 1], strides = [1, 1]} : vector<128x5xf32> to vector<128x1xf32>
    %4 = arith.fptosi %3 : vector<128x1xf32> to vector<128x1xi32>
    %5 = vector.extract_strided_slice %1 {offsets = [0, 1], sizes = [128, 1], strides = [1, 1]} : vector<128x5xf32> to vector<128x1xf32>
    %6 = arith.fptosi %5 : vector<128x1xf32> to vector<128x1xi32>
    %7 = vector.extract_strided_slice %1 {offsets = [0, 2], sizes = [128, 3], strides = [1, 1]} : vector<128x5xf32> to vector<128x3xf32>
    %c0_i32 = arith.constant 0 : i32
    %8 = arith.cmpi eq, %arg1, %c0_i32 : i32
    %9 = arith.extui %8 : i1 to i32
    %c0_i32_3 = arith.constant 0 : i32
    %10 = arith.cmpi ne, %9, %c0_i32_3 : i32
    scf.if %10 {
      %cst_22 = arith.constant 0.000000e+00 : f32
      %56 = vector.broadcast %cst_22 : f32 to vector<64x32xf32>
      %c0_23 = arith.constant 0 : index
      %c0_24 = arith.constant 0 : index
      %57 = vector.load %arg10[%c0_23, %c0_24] : memref<64x32xf32, #tpu.memory_space<vmem>>, vector<64x32xf32>
      tpu.vector_store %arg10[%c0_23, %c0_24], %56 {strides = array<i32>} : memref<64x32xf32, #tpu.memory_space<vmem>>, vector<64x32xf32>,
      %cst_25 = arith.constant 0.000000e+00 : f32
      %58 = vector.broadcast %cst_25 : f32 to vector<64x3xf32>
      %c0_26 = arith.constant 0 : index
      %c0_27 = arith.constant 0 : index
      %59 = vector.load %arg11[%c0_26, %c0_27] : memref<64x3xf32, #tpu.memory_space<vmem>>, vector<64x3xf32>
      tpu.vector_store %arg11[%c0_26, %c0_27], %58 {strides = array<i32>} : memref<64x3xf32, #tpu.memory_space<vmem>>, vector<64x3xf32>,
    } else {
    }
    %11 = tpu.iota {dimensions = array<i32: 1>} : vector<128x64xi32>
    %12 = vector.broadcast %4 : vector<128x1xi32> to vector<128x64xi32>
    %13 = arith.cmpi eq, %12, %11 : vector<128x64xi32>
    %14 = arith.extui %13 : vector<128x64xi1> to vector<128x64xi32>
    %15 = arith.sitofp %14 : vector<128x64xi32> to vector<128x64xf32>
    %16 = vector.broadcast %6 : vector<128x1xi32> to vector<128x64xi32>
    %17 = arith.cmpi eq, %16, %11 : vector<128x64xi32>
    %18 = arith.extui %17 : vector<128x64xi1> to vector<128x64xi32>
    %19 = arith.sitofp %18 : vector<128x64xi32> to vector<128x64xf32>
    %cst = arith.constant dense<0x7F800000> : vector<128xf32>
    %20 = vector.multi_reduction <minimumf>, %7, %cst [1] : vector<128x3xf32> to vector<128xf32>
    %21 = vector.shape_cast %20 : vector<128xf32> to vector<128x1xf32>
    %cst_4 = arith.constant -1.000000e+10 : f32
    %22 = vector.broadcast %cst_4 : f32 to vector<128x1xf32>
    %23 = arith.cmpf ogt, %21, %22 : vector<128x1xf32>
    %24 = arith.extui %23 : vector<128x1xi1> to vector<128x1xi32>
    %25 = arith.sitofp %24 : vector<128x1xi32> to vector<128x1xf32>
    %26 = arith.subf %15, %19 : vector<128x64xf32>
    %cst_5 = arith.constant dense<0.000000e+00> : vector<128x3xf32>
    %27 = tpu.matmul %26, %2, %cst_5 {dimension_numbers = #tpu.dot_dimension_numbers<[1], [0], [0], [1], [0, 0, 1, 1], [], []>} : vector<128x64xf32>, vector<64x3xf32>, vector<128x3xf32> -> vector<128x3xf32>
    %28 = arith.addf %27, %7 : vector<128x3xf32>
    %29 = vector.broadcast %25 : vector<128x1xf32> to vector<128x3xf32>
    %30 = arith.mulf %28, %29 : vector<128x3xf32>
    %31 = arith.mulf %30, %30 : vector<128x3xf32>
    %cst_6 = arith.constant dense<0.000000e+00> : vector<128xf32>
    %32 = vector.multi_reduction <add>, %31, %cst_6 [1] : vector<128x3xf32> to vector<128xf32>
    %33 = vector.shape_cast %32 : vector<128xf32> to vector<128x1xf32>
    %34 = math.sqrt %33 : vector<128x1xf32>
    %c0_7 = arith.constant 0 : index
    %c0_8 = arith.constant 0 : index
    %35 = vector.load %arg4[%c0_7, %c0_8] : memref<1x32xf32, #tpu.memory_space<vmem>>, vector<1x32xf32>
    %36 = vector.broadcast %34 : vector<128x1xf32> to vector<128x32xf32>
    %37 = vector.broadcast %35 : vector<1x32xf32> to vector<128x32xf32>
    %38 = arith.subf %36, %37 : vector<128x32xf32>
    %39 = arith.mulf %38, %38 : vector<128x32xf32>
    %cst_9 = arith.constant -1.000000e+00 : f32
    %40 = vector.broadcast %cst_9 : f32 to vector<128x32xf32>
    %41 = arith.mulf %40, %39 : vector<128x32xf32>
    %42 = math.exp %41 : vector<128x32xf32>
    %43 = vector.broadcast %25 : vector<128x1xf32> to vector<128x32xf32>
    %44 = arith.mulf %42, %43 : vector<128x32xf32>
    %c0_10 = arith.constant 0 : index
    %c0_11 = arith.constant 0 : index
    %45 = vector.load %arg10[%c0_10, %c0_11] : memref<64x32xf32, #tpu.memory_space<vmem>>, vector<64x32xf32>
    %cst_12 = arith.constant dense<0.000000e+00> : vector<64x32xf32>
    %46 = tpu.matmul %15, %44, %cst_12 {dimension_numbers = #tpu.dot_dimension_numbers<[0], [0], [1], [1], [0, 1, 1, 1], [], []>} : vector<128x64xf32>, vector<128x32xf32>, vector<64x32xf32> -> vector<64x32xf32>
    %47 = arith.addf %45, %46 : vector<64x32xf32>
    %c0_13 = arith.constant 0 : index
    %c0_14 = arith.constant 0 : index
    %48 = vector.load %arg10[%c0_13, %c0_14] : memref<64x32xf32, #tpu.memory_space<vmem>>, vector<64x32xf32>
    tpu.vector_store %arg10[%c0_13, %c0_14], %47 {strides = array<i32>} : memref<64x32xf32, #tpu.memory_space<vmem>>, vector<64x32xf32>,
    %c0_15 = arith.constant 0 : index
    %c0_16 = arith.constant 0 : index
    %49 = vector.load %arg11[%c0_15, %c0_16] : memref<64x3xf32, #tpu.memory_space<vmem>>, vector<64x3xf32>
    %cst_17 = arith.constant dense<0.000000e+00> : vector<64x3xf32>
    %50 = tpu.matmul %19, %30, %cst_17 {dimension_numbers = #tpu.dot_dimension_numbers<[0], [0], [1], [1], [0, 1, 1, 1], [], []>} : vector<128x64xf32>, vector<128x3xf32>, vector<64x3xf32> -> vector<64x3xf32>
    %51 = arith.addf %49, %50 : vector<64x3xf32>
    %c0_18 = arith.constant 0 : index
    %c0_19 = arith.constant 0 : index
    %52 = vector.load %arg11[%c0_18, %c0_19] : memref<64x3xf32, #tpu.memory_space<vmem>>, vector<64x3xf32>
    tpu.vector_store %arg11[%c0_18, %c0_19], %51 {strides = array<i32>} : memref<64x3xf32, #tpu.memory_space<vmem>>, vector<64x3xf32>,
    %c0_i32_20 = arith.constant 0 : i32
    %53 = arith.cmpi eq, %arg1, %c0_i32_20 : i32
    %54 = arith.extui %53 : i1 to i32
    %c0_i32_21 = arith.constant 0 : i32
    %55 = arith.cmpi ne, %54, %c0_i32_21 : i32
    scf.if %55 {
      %56 = vector.extract_strided_slice %0 {offsets = [0, 3], sizes = [64, 1], strides = [1, 1]} : vector<64x4xf32> to vector<64x1xf32>
      %57 = arith.fptosi %56 : vector<64x1xf32> to vector<64x1xi32>
      %58 = tpu.iota {dimensions = array<i32: 1>} : vector<64x2xi32>
      %59 = vector.broadcast %57 : vector<64x1xi32> to vector<64x2xi32>
      %60 = arith.cmpi eq, %59, %58 : vector<64x2xi32>
      %61 = arith.extui %60 : vector<64x2xi1> to vector<64x2xi32>
      %62 = arith.sitofp %61 : vector<64x2xi32> to vector<64x2xf32>
      %c0_22 = arith.constant 0 : index
      %c0_23 = arith.constant 0 : index
      %63 = vector.load %arg10[%c0_22, %c0_23] : memref<64x32xf32, #tpu.memory_space<vmem>>, vector<64x32xf32>
      %c0_24 = arith.constant 0 : index
      %c0_25 = arith.constant 0 : index
      %64 = vector.load %arg6[%c0_24, %c0_25] : memref<32x32xf32, #tpu.memory_space<vmem>>, vector<32x32xf32>
      %cst_26 = arith.constant dense<0.000000e+00> : vector<64x32xf32>
      %65 = tpu.matmul %63, %64, %cst_26 {dimension_numbers = #tpu.dot_dimension_numbers<[1], [0], [0], [1], [0, 0, 1, 1], [], []>} : vector<64x32xf32>, vector<32x32xf32>, vector<64x32xf32> -> vector<64x32xf32>
      %c0_27 = arith.constant 0 : index
      %c0_28 = arith.constant 0 : index
      %66 = vector.load %arg5[%c0_27, %c0_28] : memref<2x32xf32, #tpu.memory_space<vmem>>, vector<2x32xf32>
      %cst_29 = arith.constant dense<0.000000e+00> : vector<64x32xf32>
      %67 = tpu.matmul %62, %66, %cst_29 {dimension_numbers = #tpu.dot_dimension_numbers<[1], [0], [0], [1], [0, 0, 1, 1], [], []>} : vector<64x2xf32>, vector<2x32xf32>, vector<64x32xf32> -> vector<64x32xf32>
      %68 = arith.addf %65, %67 : vector<64x32xf32>
      %69 = math.tanh %68 : vector<64x32xf32>
      %c0_30 = arith.constant 0 : index
      %c0_31 = arith.constant 0 : index
      %70 = vector.load %arg7[%c0_30, %c0_31] : memref<1x32xf32, #tpu.memory_space<vmem>>, vector<1x32xf32>
      %71 = vector.broadcast %70 : vector<1x32xf32> to vector<64x32xf32>
      %72 = arith.mulf %69, %71 : vector<64x32xf32>
      %cst_32 = arith.constant dense<0.000000e+00> : vector<64xf32>
      %73 = vector.multi_reduction <add>, %72, %cst_32 [1] : vector<64x32xf32> to vector<64xf32>
      %74 = vector.shape_cast %73 : vector<64xf32> to vector<64x1xf32>
      %c0_33 = arith.constant 0 : index
      %c0_34 = arith.constant 0 : index
      %75 = vector.load %arg8[%c0_33, %c0_34] : memref<1x1xf32, #tpu.memory_space<vmem>>, vector<1x1xf32>
      %76 = vector.broadcast %75 : vector<1x1xf32> to vector<64x1xf32>
      %77 = arith.addf %74, %76 : vector<64x1xf32>
      %c0_35 = arith.constant 0 : index
      %c0_36 = arith.constant 0 : index
      %78 = vector.load %arg11[%c0_35, %c0_36] : memref<64x3xf32, #tpu.memory_space<vmem>>, vector<64x3xf32>
      %79 = vector.broadcast %77 : vector<64x1xf32> to vector<64x3xf32>
      %80 = arith.mulf %79, %78 : vector<64x3xf32>
      %81 = tpu.iota {dimensions = array<i32: 0>} : vector<64x8xi32>
      %82 = tpu.iota {dimensions = array<i32: 1>} : vector<64x8xi32>
      %c8_i32 = arith.constant 8 : i32
      %83 = vector.broadcast %c8_i32 : i32 to vector<64x8xi32>
      %84 = arith.muli %82, %83 : vector<64x8xi32>
      %85 = arith.subi %81, %84 : vector<64x8xi32>
      %c0_i32_37 = arith.constant 0 : i32
      %86 = vector.broadcast %c0_i32_37 : i32 to vector<64x8xi32>
      %87 = arith.cmpi sge, %85, %86 : vector<64x8xi32>
      %c8_i32_38 = arith.constant 8 : i32
      %88 = vector.broadcast %c8_i32_38 : i32 to vector<64x8xi32>
      %89 = arith.cmpi slt, %85, %88 : vector<64x8xi32>
      %90 = arith.andi %87, %89 : vector<64x8xi1>
      %91 = arith.extui %90 : vector<64x8xi1> to vector<64x8xi32>
      %92 = arith.sitofp %91 : vector<64x8xi32> to vector<64x8xf32>
      %cst_39 = arith.constant dense<0.000000e+00> : vector<8x3xf32>
      %93 = tpu.matmul %92, %80, %cst_39 {dimension_numbers = #tpu.dot_dimension_numbers<[0], [0], [1], [1], [0, 1, 1, 1], [], []>} : vector<64x8xf32>, vector<64x3xf32>, vector<8x3xf32> -> vector<8x3xf32>
      %94 = tpu.iota {dimensions = array<i32: 1>} : vector<8x128xi32>
      %c0_i32_40 = arith.constant 0 : i32
      %95 = vector.broadcast %c0_i32_40 : i32 to vector<8x128xi32>
      %96 = arith.cmpi eq, %94, %95 : vector<8x128xi32>
      %97 = vector.extract_strided_slice %93 {offsets = [0, 0], sizes = [8, 1], strides = [1, 1]} : vector<8x3xf32> to vector<8x1xf32>
      %c1_i32 = arith.constant 1 : i32
      %98 = vector.broadcast %c1_i32 : i32 to vector<8x128xi32>
      %99 = arith.cmpi eq, %94, %98 : vector<8x128xi32>
      %100 = vector.extract_strided_slice %93 {offsets = [0, 1], sizes = [8, 1], strides = [1, 1]} : vector<8x3xf32> to vector<8x1xf32>
      %c2_i32 = arith.constant 2 : i32
      %101 = vector.broadcast %c2_i32 : i32 to vector<8x128xi32>
      %102 = arith.cmpi eq, %94, %101 : vector<8x128xi32>
      %103 = vector.extract_strided_slice %93 {offsets = [0, 2], sizes = [8, 1], strides = [1, 1]} : vector<8x3xf32> to vector<8x1xf32>
      %cst_41 = arith.constant 0.000000e+00 : f32
      %104 = vector.shape_cast %103 : vector<8x1xf32> to vector<8x1xf32>
      %105 = vector.broadcast %104 : vector<8x1xf32> to vector<8x128xf32>
      %106 = vector.broadcast %cst_41 : f32 to vector<8x128xf32>
      %107 = arith.select %102, %105, %106 : vector<8x128xi1>, vector<8x128xf32>
      %108 = vector.shape_cast %100 : vector<8x1xf32> to vector<8x1xf32>
      %109 = vector.broadcast %108 : vector<8x1xf32> to vector<8x128xf32>
      %110 = arith.select %99, %109, %107 : vector<8x128xi1>, vector<8x128xf32>
      %111 = vector.shape_cast %97 : vector<8x1xf32> to vector<8x1xf32>
      %112 = vector.broadcast %111 : vector<8x1xf32> to vector<8x128xf32>
      %113 = arith.select %96, %112, %110 : vector<8x128xi1>, vector<8x128xf32>
      %c0_42 = arith.constant 0 : index
      %c0_43 = arith.constant 0 : index
      %114 = vector.load %arg9[%c0_42, %c0_43] : memref<8x128xf32, #tpu.memory_space<vmem>>, vector<8x128xf32>
      tpu.vector_store %arg9[%c0_42, %c0_43], %113 {strides = array<i32>} : memref<8x128xf32, #tpu.memory_space<vmem>>, vector<8x128xf32>,
    } else {
    }
    return
  }
  func.func @transform_0(%arg0: i32, %arg1: i32) -> (i32, i32) {
    %c1_i32 = arith.constant 1 : i32
    %0 = arith.muli %arg0, %c1_i32 : i32
    %1 = arith.addi %0, %arg1 : i32
    %c0_i32 = arith.constant 0 : i32
    %c0_i32_0 = arith.constant 0 : i32
    return %1, %c0_i32 : i32, i32
  }
  func.func @transform_1(%arg0: i32, %arg1: i32) -> (i32, i32) {
    %c0_i32 = arith.constant 0 : i32
    %c0_i32_0 = arith.constant 0 : i32
    return %arg0, %c0_i32 : i32, i32
  }
  func.func @transform_2(%arg0: i32, %arg1: i32) -> (i32, i32) {
    %c0_i32 = arith.constant 0 : i32
    %c0_i32_0 = arith.constant 0 : i32
    %c0_i32_1 = arith.constant 0 : i32
    return %c0_i32, %c0_i32_0 : i32, i32
  }
  func.func @transform_3(%arg0: i32, %arg1: i32) -> (i32, i32) {
    %c0_i32 = arith.constant 0 : i32
    %c0_i32_0 = arith.constant 0 : i32
    %c0_i32_1 = arith.constant 0 : i32
    return %c0_i32, %c0_i32_0 : i32, i32
  }
  func.func @transform_4(%arg0: i32, %arg1: i32) -> (i32, i32) {
    %c0_i32 = arith.constant 0 : i32
    %c0_i32_0 = arith.constant 0 : i32
    %c0_i32_1 = arith.constant 0 : i32
    return %c0_i32, %c0_i32_0 : i32, i32
  }
  func.func @transform_5(%arg0: i32, %arg1: i32) -> (i32, i32) {
    %c0_i32 = arith.constant 0 : i32
    %c0_i32_0 = arith.constant 0 : i32
    %c0_i32_1 = arith.constant 0 : i32
    return %c0_i32, %c0_i32_0 : i32, i32
  }
  func.func @transform_6(%arg0: i32, %arg1: i32) -> (i32, i32) {
    %c0_i32 = arith.constant 0 : i32
    %c0_i32_0 = arith.constant 0 : i32
    %c0_i32_1 = arith.constant 0 : i32
    return %c0_i32, %c0_i32_0 : i32, i32
  }
  func.func @transform_7(%arg0: i32, %arg1: i32) -> (i32, i32) {
    %c0_i32 = arith.constant 0 : i32
    %c0_i32_0 = arith.constant 0 : i32
    return %arg0, %c0_i32 : i32, i32
  }
}

</mosaic_0001>

<bundles_post_ra>
// kernel: tpu_custom_call.1
= control target key start
LH: loop header
LB: loop body
LE: loop exit
PB: predicated region body
PF: predicated region fallthrough
CT: control target
= control target key end

     0   :  { %s3172_s0 = inlined_call_operand.vmem [shape: f32[128,5], index: 0, kind: input, shape index: {}]   ;;  %s3173_s1 = inlined_call_operand.vmem [shape: f32[64,4], index: 1, kind: input, shape index: {}]   ;;  %s3174_s2 = inlined_call_operand.vmem [shape: f32[1,32], index: 2, kind: input, shape index: {}]   ;;  %s3175_s3 = inlined_call_operand.vmem [shape: f32[2,32], index: 3, kind: input, shape index: {}]   ;;  %s3176_s4 = inlined_call_operand.vmem [shape: f32[32,32], index: 4, kind: input, shape index: {}]   ;;  %s3177_s5 = inlined_call_operand.vmem [shape: f32[1,32], index: 5, kind: input, shape index: {}]   ;;  %s3178_s6 = inlined_call_operand.<no memory space> [shape: f32[1,1], index: 6, kind: input, shape index: {}]   ;;  %s3179_s7 = inlined_call_operand.hbm [shape: f32[8,128], index: 7, kind: output, shape index: {}]  }
   0x1   :  { %v12_v0 = vstv %s3178_s6 }
   0x2   :  { %13 = vst [vmem:[#allocation4] sm:$0x1] %v12_v0 }
   0x3   :  { %v2055_v1 = vld [vmem:[%s3172_s0 + $0x10] sm:$0xff]  ;;  %v2060_v2 = vld [vmem:[%s3172_s0 + $0x8] sm:$0xff]  ;;  %v2065_v3 = vld [vmem:[%s3172_s0] sm:$0xff]  ;;  %v3180_v4 = vmov 1   ;;  %v3182_v5 = vmov 0  }
   0x4   :  { %1875 = vset.pattern.permute.xlu2 %v3180_v4  ;;  %1873 = vset.pattern.permute.xlu1 %v3182_v5  ;;  %vm1754_vm0 = vcmp.lt.s32.totalorder %v2055_v1, 0  ;;  %v1755_v6 = vceil.f32 %v2055_v1  ;;  %v1756_v7 = vfloor.f32 %v2055_v1  ;;  %vm1749_vm1 = vcmp.lt.s32.totalorder %v2060_v2, 0  ;;  %v2076_v8 = vld [vmem:[%s3172_s0 + $0x18] sm:$0xff] }
   0x5   :  { %1871 = vset.pattern.permute.xlu0 %v3182_v5  ;;  %v1750_v9 = vceil.f32 %v2060_v2  ;;  %v1751_v10 = vfloor.f32 %v2060_v2  ;;  %vm1744_vm2 = vcmp.lt.s32.totalorder %v2065_v3, 0  ;;  %v1745_v11 = vceil.f32 %v2065_v3 }
   0x6   :  { %v2083_v12 = vsel %vm1754_vm0, %v1755_v6, %v1756_v7  ;;  %v1746_v13 = vfloor.f32 %v2065_v3  ;;  %v1760_v14 = vceil.f32 %v2076_v8  ;;  %vm1759_vm3 = vcmp.lt.s32.totalorder %v2076_v8, 0 }
   0x7   :  { %v1758_v15 = vcvt.f32.s32 %v2083_v12  ;;  %v1752_v16 = vsel %vm1749_vm1, %v1750_v9, %v1751_v10  ;;  %v1761_v17 = vfloor.f32 %v2076_v8 }
   0x8   :  { %14 = vsyncpa [#allocation6], 0  ;;  %v1753_v18 = vcvt.f32.s32 %v1752_v16  ;;  %v1747_v19 = vsel %vm1744_vm2, %v1745_v11, %v1746_v13  ;;  %v2095_v22 = vld [vmem:[%s3172_s0 + $0x38] sm:$0xff]  ;;  %v2102_v26 = vld [vmem:[%s3172_s0 + $0x30] sm:$0xff]  ;;  %s2004_s10 = smov 126   ;;  %vm307_vm15 = vcmask 39952  }
   0x9   :  { %218 = vperm.xlu2 %1875, %v1758_v15   ;;  %v1748_v20 = vcvt.f32.s32 %v1747_v19  ;;  %v1762_v21 = vsel %vm1759_vm3, %v1760_v14, %v1761_v17  ;;  %v1780_v24 = vceil.f32 %v2095_v22  ;;  %v1781_v25 = vfloor.f32 %v2095_v22  ;;  %v2115_v30 = vld [vmem:[%s3172_s0 + $0x40] sm:$0xff]  ;;  %v2125_v35 = vld [vmem:[%s3172_s0 + $0x58] sm:$0xff]  ;;  %v2156_v49 = vld [vmem:[%s3172_s0 + $0x28] sm:$0xff]  ;;  %s1625_s18 = sshll.u32 %s3179_s7, 4  ;;  %s1626_s18 = int_to_ptr.hbm [resolvable:$true] %s1625_s18 }
   0xa   :  { %119 = vperm.xlu1 %1873, %v1753_v18   ;;  %v1763_v23 = vcvt.f32.s32 %v1762_v21  ;;  %vm1779_vm4 = vcmp.lt.s32.totalorder %v2095_v22, 0  ;;  %v1775_v27 = vceil.f32 %v2102_v26  ;;  %v1776_v28 = vfloor.f32 %v2102_v26  ;;  %v2131_v36 = vld [vmem:[%s3172_s0 + $0x20] sm:$0xff]  ;;  %v2165_v55 = vld [vmem:[%s3172_s0 + $0x68] sm:$0xff]  ;;  %v73_v9 = vld [vmem:[%s3172_s0 + $0x70] sm:$0xff] }
   0xb   :  { %116 = vperm.xlu0 %1871, %v1748_v20   ;;  %v2108_v29 = vsel %vm1779_vm4, %v1780_v24, %v1781_v25  ;;  %vm1774_vm5 = vcmp.lt.s32.totalorder %v2102_v26, 0  ;;  %v1785_v33 = vceil.f32 %v2115_v30  ;;  %v1786_v34 = vfloor.f32 %v2115_v30  ;;  %v2144_v43 = vld [vmem:[%s3172_s0 + $0x60] sm:$0xff]  ;;  %v2178_v60 = vld [vmem:[%s3172_s0 + $0x48] sm:$0xff]  ;;  %v2195_v17 = vld [vmem:[%s3172_s0 + $0x50] sm:$0xff] }
   0xc   :  { %v1783_v31 = vcvt.f32.s32 %v2108_v29  ;;  %v2118_v32 = vsel %vm1774_vm5, %v1775_v27, %v1776_v28  ;;  %vm1784_vm6 = vcmp.lt.s32.totalorder %v2115_v30, 0  ;;  %v1800_v38 = vceil.f32 %v2125_v35  ;;  %v2235_v12 = vld [vmem:[%s3173_s1 + $0x38] sm:$0xff] }
   0xd   :  { %v1778_v37 = vcvt.f32.s32 %v2118_v32  ;;  %v1801_v39 = vfloor.f32 %v2125_v35  ;;  %v1787_v40 = vsel %vm1784_vm6, %v1785_v33, %v1786_v34  ;;  %vm1799_vm7 = vcmp.lt.s32.totalorder %v2125_v35, 0  ;;  %541 = vmatpush.msra.mxu0 %v2235_v12 }
   0xe   :  { %v1765_v41 = vceil.f32 %v2131_v36  ;;  %v1766_v42 = vfloor.f32 %v2131_v36  ;;  %vm1764_vm8 = vcmp.lt.s32.totalorder %v2131_v36, 0  ;;  %v1788_v44 = vcvt.f32.s32 %v1787_v40  ;;  %v2243_v40 = vld [vmem:[%s3173_s1 + $0x30] sm:$0xff] }
   0xf   :  { %v2148_v45 = vsel %vm1799_vm7, %v1800_v38, %v1801_v39  ;;  %v1805_v47 = vceil.f32 %v2144_v43  ;;  %v1806_v48 = vfloor.f32 %v2144_v43  ;;  %vm1804_vm9 = vcmp.lt.s32.totalorder %v2144_v43, 0  ;;  %542 = vmatpush.msra.mxu0 %v2243_v40 }
  0x10   :  { %v1767_v46 = vsel %vm1764_vm8, %v1765_v41, %v1766_v42  ;;  %v1803_v50 = vcvt.f32.s32 %v2148_v45  ;;  %v1770_v53 = vceil.f32 %v2156_v49  ;;  %v1771_v54 = vfloor.f32 %v2156_v49  ;;  %v2248_v41 = vld [vmem:[%s3173_s1 + $0x28] sm:$0xff] }
  0x11   :  { %221 = vperm.xlu2 %1875, %v1763_v23   ;;  %v1768_v51 = vcvt.f32.s32 %v1767_v46  ;;  %v1807_v52 = vsel %vm1804_vm9, %v1805_v47, %v1806_v48  ;;  %vm1769_vm10 = vcmp.lt.s32.totalorder %v2156_v49, 0  ;;  %v1810_v58 = vceil.f32 %v2165_v55  ;;  %543 = vmatpush.msra.mxu0 %v2248_v41  ;;  %v2262_v48 = vld [vmem:[%s3173_s1 + $0x20] sm:$0xff] }
  0x12   :  { %1874 = vset.pattern.permute.xlu1 %v3180_v4  ;;  %v1808_v56 = vcvt.f32.s32 %v1807_v52  ;;  %v2170_v57 = vsel %vm1769_vm10, %v1770_v53, %v1771_v54  ;;  %v1811_v59 = vfloor.f32 %v2165_v55  ;;  %vm1809_vm11 = vcmp.lt.s32.totalorder %v2165_v55, 0  ;;  %v2274_v52 = vld [vmem:[%s3173_s1 + $0x10] sm:$0xff] }
  0x13   :  { %1872 = vset.pattern.permute.xlu0 %v3180_v4  ;;  %215 = vperm.xlu1 %1874, %v1753_v18   ;;  %v1773_v61 = vcvt.f32.s32 %v2170_v57  ;;  %v1790_v63 = vceil.f32 %v2178_v60  ;;  %v1791_v0 = vfloor.f32 %v2178_v60  ;;  %vm1789_vm12 = vcmp.lt.s32.totalorder %v2178_v60, 0  ;;  %v74_v18 = vld [vmem:[%s3172_s0 + $0x78] sm:$0xff] }
  0x14   :  { %212 = vperm.xlu0 %1872, %v1748_v20   ;;  %v1812_v62 = vsel %vm1809_vm11, %v1810_v58, %v1811_v59  ;;  %v1815_v11 = vceil.f32 %v73_v9  ;;  %v1816_v13 = vfloor.f32 %v73_v9  ;;  %vm1814_vm13 = vcmp.lt.s32.totalorder %v73_v9, 0  ;;  %544 = vmatpush.msra.mxu0 %v2262_v48  ;;  %v2289_v58 = vld [vmem:[%s3173_s1 + $0x8] sm:$0xff] }
  0x15   :  { %v1813_v6 = vcvt.f32.s32 %v1812_v62  ;;  %v1792_v7 = vsel %vm1789_vm12, %v1790_v63, %v1791_v0  ;;  %v1795_v19 = vceil.f32 %v2195_v17  ;;  %v1796_v20 = vfloor.f32 %v2195_v17  ;;  %v2298_v63 = vld [vmem:[%s3173_s1] sm:$0xff] }
  0x16   :  { %v1793_v10 = vcvt.f32.s32 %v1792_v7  ;;  %v1817_v14 = vsel %vm1814_vm13, %v1815_v11, %v1816_v13  ;;  %vm1794_vm14 = vcmp.lt.s32.totalorder %v2195_v17, 0  ;;  %v353_v24 = vsel %vm307_vm15, %v74_v18, inf }
  0x17   :  { %v1818_v16 = vcvt.f32.s32 %v1817_v14  ;;  %v2205_v21 = vsel %vm1794_vm14, %v1795_v19, %v1796_v20  ;;  %v1820_v25 = vceil.f32 %v74_v18  ;;  %v1821_v27 = vfloor.f32 %v74_v18 }
  0x18   :  { %vm1819_vm0 = vcmp.lt.s32.totalorder %v74_v18, 0  ;;  %v350_v34 = vsel %vm307_vm15, %v73_v9, inf  ;;  %v341_v46 = vsel %vm307_vm15, %v2125_v35, inf  ;;  %v3184_v53 = vmov 0.0  }
  0x19   :  { %233 = vperm.xlu2 %1875, %v1783_v31   ;;  %v2214_v28 = vsel %vm1819_vm0, %v1820_v25, %v1821_v27  ;;  %vm484_vm5 = vcmask 523264  }
  0x1a   :  { %v1823_v29 = vcvt.f32.s32 %v2214_v28  ;;  %v332_v28 = vsel %vm307_vm15, %v2115_v30, inf }
  0x1b   :  { %1876 = vset.pattern.permute.xlu1 %v3182_v5 }
  0x1c   :  { %230 = vperm.xlu0 %1872, %v1778_v37   ;;  %125 = vperm.xlu1 %1876, %v1763_v23   ;;  %v1798_v23 = vcvt.f32.s32 %v2205_v21 }
  0x21   :  { %236 = vperm.xlu2 %1875, %v1788_v44  }
  0x24   :  { %245 = vperm.xlu0 %1872, %v1803_v50   ;;  %1877 = vset.pattern.permute.xlu1 %v3180_v4 }
  0x25   :  { %224 = vperm.xlu1 %1877, %v1768_v51  }
  0x29   :  { %248 = vperm.xlu2 %1875, %v1808_v56  }
  0x2c   :  { %1880 = vset.pattern.permute.xlu0 %v3182_v5 }
  0x2d   :  { %128 = vperm.xlu0 %1880, %v1768_v51   ;;  %227 = vperm.xlu1 %1877, %v1773_v61   ;;  %v2268_v51 = vld [vmem:[%s3173_s1 + $0x18] sm:$0xff] }
  0x2e   :  { %545 = vmatpush.msra.mxu0 %v2268_v51 }
  0x30   :  { %546 = vmatpush.msra.mxu0 %v2274_v52 }
  0x31   :  { %251 = vperm.xlu2 %1875, %v1813_v6  }
  0x32   :  { %547 = vmatpush.msra.mxu0 %v2289_v58 }
  0x34   :  { %548 = vmatpush.msra.mxu0 %v2298_v63 }
  0x35   :  { %143 = vperm.xlu0 %1880, %v1793_v10   ;;  %1878 = vset.pattern.permute.xlu1 %v3182_v5 }
  0x36   :  { %137 = vperm.xlu1 %1878, %v1783_v31   ;;  %v347_v31 = vsel %vm307_vm15, %v2165_v55, inf }
  0x39   :  { %1883 = vset.pattern.permute.xlu2 %v3182_v5 }
  0x3d   :  { %158 = vperm.xlu0 %1880, %v1818_v16  }
  0x3e   :  { %140 = vperm.xlu1 %1878, %v1788_v44   ;;  %v344_v44 = vsel %vm307_vm15, %v2144_v43, inf }
  0x45   :  { %466 = vrot.lane.b32.xlu0 %v74_v18, %s2004_s10 }
  0x46   :  { %1879 = vset.pattern.permute.xlu1 %v3180_v4 }
  0x47   :  { %239 = vperm.xlu1 %1879, %v1793_v10   ;;  %v335_v10 = vsel %vm307_vm15, %v2178_v60, inf }
  0x4d   :  { %464 = vrot.lane.b32.xlu0 %v73_v9, %s2004_s10 }
  0x4f   :  { %242 = vperm.xlu1 %1879, %v1798_v23  }
  0x57   :  { %1881 = vset.pattern.permute.xlu1 %v3182_v5 }
  0x58   :  { %152 = vperm.xlu1 %1881, %v1808_v56  }
  0x5a   :  { %354 = vmin.xlane.f32.xlu2 %v353_v24  ;;  %v338_v24 = vsel %vm307_vm15, %v2195_v17, inf }
  0x60   :  { %155 = vperm.xlu1 %1881, %v1813_v6  }
  0x63   :  { %v2227_v33 = vpop.permute.xlu2 %218 }
  0x68   :  { %1882 = vset.pattern.permute.xlu1 %v3180_v4 }
  0x69   :  { %254 = vperm.xlu1 %1882, %v1818_v16  }
  0x6b   :  { %v2237_v38 = vpop.permute.xlu2 %221 }
  0x71   :  { %257 = vperm.xlu1 %1882, %v1823_v29  }
  0x72   :  { %122 = vperm.xlu2 %1883, %v1758_v15   ;;  %v3181_v15 = vlaneseq }
  0x74   :  { %v2256_v47 = vand.u32 127, %v3181_v15 }
  0x76   :  { %3210 = vst [vmem:[#allocation8_spill] sm:$0xff] %v2256_v47  ;;  %vm261_vm6 = vcmp.eq.s32.totalorder %v2227_v33, %v2256_v47  ;;  %vm262_vm9 = vcmp.eq.s32.totalorder %v2237_v38, %v2256_v47 }
  0x77   :  { %348 = vmin.xlane.f32.xlu0 %v347_v31  ;;  %v2360_v19 = vsel %vm262_vm9, 1.0, %v3184_v53  ;;  %v314_v31 = vsel %vm307_vm15, %v2055_v1, inf }
  0x7a   :  { %462 = vrot.lane.b32.xlu2 %v2165_v55, %s2004_s10  ;;  %v2281_v55 = vpop.permute.xlu2 %233 }
  0x7c   :  { %v120_v42 = vpop.permute.xlu1 %119 }
  0x7d   :  { %v117_v39 = vpop.permute.xlu0 %116  ;;  %vm164_vm3 = vcmp.eq.s32.totalorder %v120_v42, %v2256_v47 }
  0x7e   :  { %vm163_vm1 = vcmp.eq.s32.totalorder %v117_v39, %v2256_v47  ;;  %v2305_v0 = vsel %vm164_vm3, 1.0, %v3184_v53 }
  0x7f   :  { %v2277_v54 = vsel %vm163_vm1, 1.0, %v3184_v53 }
  0x82   :  { %v2310_v7 = vpop.permute.xlu2 %236 }
  0x85   :  { %v216_v62 = vpop.permute.xlu1 %215 }
  0x86   :  { %vm260_vm4 = vcmp.eq.s32.totalorder %v216_v62, %v2256_v47 }
  0x87   :  { %v2308_v6 = vsel %vm260_vm4, 1.0, %v3184_v53  ;;  %vm267_vm4 = vcmp.eq.s32.totalorder %v2310_v7, %v2256_v47 }
  0x88   :  { %v405_v9 = vsub.f32 %v2305_v0, %v2308_v6 }
  0x8a   :  { %v2317_v11 = vpop.permute.xlu2 %248 }
  0x8b   :  { %458 = vrot.lane.b32.xlu0 %v2125_v35, %s2004_s10  ;;  %v213_v35 = vpop.permute.xlu0 %212 }
  0x8c   :  { %vm259_vm2 = vcmp.eq.s32.totalorder %v213_v35, %v2256_v47 }
  0x8d   :  { %v2284_v56 = vsel %vm259_vm2, 1.0, %v3184_v53  ;;  %vm266_vm2 = vcmp.eq.s32.totalorder %v2281_v55, %v2256_v47 }
  0x8e   :  { %v404_v59 = vsub.f32 %v2277_v54, %v2284_v56  ;;  %v126_v57 = vpop.permute.xlu1 %125 }
  0x8f   :  { %vm166_vm8 = vcmp.eq.s32.totalorder %v126_v57, %v2256_v47  ;;  %v2452_v57 = vsel %vm267_vm4, 1.0, %v3184_v53  ;;  %vm104_vm4 = vcmask 23552  }
  0x90   :  { %1688 = vmatmul.msk.f32.vlgmr.msra.gmra.mxu0 %vm484_vm5, %v404_v59  ;;  %v2357_v45 = vsel %vm166_vm8, 1.0, %v3184_v53  ;;  %3216 = vst [vmem:[#allocation14_spill] sm:$0xff] %v2452_v57 }
  0x91   :  { %v407_v21 = vsub.f32 %v2357_v45, %v2360_v19  ;;  %105 = vst.msk [vmem:[#allocation3] sm:$0xff] %vm104_vm4, %v3184_v53 }
  0x92   :  { %v2325_v13 = vpop.permute.xlu2 %251  ;;  %106 = vst.msk [vmem:[#allocation3 + $0x8] sm:$0xff] %vm104_vm4, %v3184_v53 }
  0x93   :  { %456 = vrot.lane.b32.xlu0 %v2195_v17, %s2004_s10  ;;  %v2327_v14 = vpop.permute.xlu0 %230  ;;  %v323_v17 = vsel %vm307_vm15, %v2156_v49, inf  ;;  %107 = vst.msk [vmem:[#allocation3 + $0x10] sm:$0xff] %vm104_vm4, %v3184_v53 }
  0x94   :  { %vm265_vm14 = vcmp.eq.s32.totalorder %v2327_v14, %v2256_v47  ;;  %108 = vst.msk [vmem:[#allocation3 + $0x18] sm:$0xff] %vm104_vm4, %v3184_v53 }
  0x95   :  { %v2421_v35 = vsel %vm265_vm14, 1.0, %v3184_v53  ;;  %109 = vst.msk [vmem:[#allocation3 + $0x20] sm:$0xff] %vm104_vm4, %v3184_v53 }
  0x96   :  { %3213 = vst [vmem:[#allocation11_spill] sm:$0xff] %v2421_v35 }
  0x97   :  { %v225_v20 = vpop.permute.xlu1 %224  ;;  %110 = vst.msk [vmem:[#allocation3 + $0x28] sm:$0xff] %vm104_vm4, %v3184_v53 }
  0x98   :  { %1689 = vmatmul.msk.f32.gmra.mxu0 %vm484_vm5, %v405_v9  ;;  %vm263_vm10 = vcmp.eq.s32.totalorder %v225_v20, %v2256_v47  ;;  %111 = vst.msk [vmem:[#allocation3 + $0x30] sm:$0xff] %vm104_vm4, %v3184_v53 }
  0x99   :  { %112 = vst.msk [vmem:[#allocation3 + $0x38] sm:$0xff] %vm104_vm4, %v3184_v53 }
  0x9b   :  { %351 = vmin.xlane.f32.xlu1 %v350_v34 }
  0x9f   :  { %v228_v38 = vpop.permute.xlu1 %227 }
  0xa0   :  { %vm264_vm12 = vcmp.eq.s32.totalorder %v228_v38, %v2256_v47 }
  0xa1   :  { %v2407_v42 = vsel %vm264_vm12, 1.0, %v3184_v53 }
  0xa2   :  { %3212 = vst [vmem:[#allocation10_spill] sm:$0xff] %v2407_v42 }
  0xa3   :  { %345 = vmin.xlane.f32.xlu1 %v344_v44  ;;  %342 = vmin.xlane.f32.xlu2 %v341_v46 }
  0xbb   :  { %131 = vperm.xlu2 %1883, %v1773_v61  }
  0xbc   :  { %460 = vrot.lane.b32.xlu1 %v2144_v43, %s2004_s10  ;;  %v2337_v43 = vpop.permute.xlu0 %245 }
  0xbd   :  { %336 = vmin.xlane.f32.xlu0 %v335_v10  ;;  %v2438_v10 = vsel %vm266_vm2, 1.0, %v3184_v53 }
  0xbe   :  { %3214 = vst [vmem:[#allocation12_spill] sm:$0xff] %v2438_v10 }
  0xc3   :  { %134 = vperm.xlu2 %1883, %v1778_v37   ;;  %v2343_v37 = vsel %vm261_vm6, 1.0, %v3184_v53 }
  0xcb   :  { %146 = vperm.xlu2 %1883, %v1798_v23   ;;  %v2368_v23 = vsel %vm263_vm10, 1.0, %v3184_v53 }
  0xcc   :  { %3211 = vst [vmem:[#allocation9_spill] sm:$0xff] %v2368_v23 }
  0xcd   :  { %v2331_v16 = vpop.xlane.xlu2 %354 }
  0xd1   :  { %450 = vrot.lane.b32.xlu0 %v2095_v22, %s2004_s10 }
  0xd3   :  { %149 = vperm.xlu2 %1883, %v1803_v50   ;;  %v129_v50 = vpop.permute.xlu0 %128 }
  0xd4   :  { %vm167_vm11 = vcmp.eq.s32.totalorder %v129_v50, %v2256_v47 }
  0xd5   :  { %v123_v32 = vpop.permute.xlu2 %122  ;;  %v2375_v25 = vsel %vm167_vm11, 1.0, %v3184_v53  ;;  %vm270_vm11 = vcmp.eq.s32.totalorder %v2337_v43, %v2256_v47 }
  0xd6   :  { %vm165_vm7 = vcmp.eq.s32.totalorder %v123_v32, %v2256_v47  ;;  %v408_v27 = vsub.f32 %v2375_v25, %v2368_v23 }
  0xd7   :  { %v2346_v61 = vsel %vm165_vm7, 1.0, %v3184_v53 }
  0xd8   :  { %v406_v18 = vsub.f32 %v2346_v61, %v2343_v37 }
  0xda   :  { %1690 = vmatmul.msk.f32.gmra.mxu0 %vm484_vm5, %v406_v18 }
  0xdb   :  { %161 = vperm.xlu2 %1883, %v1823_v29   ;;  %v317_v29 = vsel %vm307_vm15, %v2076_v8, inf  ;;  %v144_v20 = vpop.permute.xlu0 %143 }
  0xdc   :  { %vm172_vm7 = vcmp.eq.s32.totalorder %v144_v20, %v2256_v47 }
  0xdd   :  { %v2392_v33 = vpop.permute.xlu2 %462  ;;  %v2465_v7 = vsel %vm172_vm7, 1.0, %v3184_v53 }
  0xde   :  { %3218 = vst [vmem:[#allocation16_spill] sm:$0xff] %v2465_v7 }
  0xe2   :  { %1691 = vmatmul.msk.f32.gmra.mxu0 %vm484_vm5, %v407_v21 }
  0xe3   :  { %454 = vrot.lane.b32.xlu2 %v2178_v60, %s2004_s10  ;;  %v329_v60 = vsel %vm307_vm15, %v2095_v22, inf  ;;  %v311_v22 = vsel %vm307_vm15, %v2060_v2, inf }
  0xe6   :  { %339 = vmin.xlane.f32.xlu1 %v338_v24  ;;  %v320_v24 = vsel %vm307_vm15, %v2131_v36, inf }
  0xea   :  { %1692 = vmatmul.msk.f32.gmra.mxu0 %vm484_vm5, %v408_v27 }
  0xeb   :  { %452 = vrot.lane.b32.xlu2 %v2115_v30, %s2004_s10  ;;  %v326_v30 = vsel %vm307_vm15, %v2102_v26, inf }
  0xee   :  { %333 = vmin.xlane.f32.xlu1 %v332_v28 }
  0xf6   :  { %330 = vmin.xlane.f32.xlu1 %v329_v60 }
  0xfb   :  { %324 = vmin.xlane.f32.xlu0 %v323_v17 }
 0x103   :  { %318 = vmin.xlane.f32.xlu0 %v317_v29 }
 0x10b   :  { %315 = vmin.xlane.f32.xlu0 %v314_v31 }
 0x10f   :  { %448 = vrot.lane.b32.xlu1 %v2102_v26, %s2004_s10 }
 0x113   :  { %312 = vmin.xlane.f32.xlu0 %v311_v22  ;;  %v2490_v22 = vsel %vm270_vm11, 1.0, %v3184_v53  ;;  %vm371_vm11 = vcmp.gt.f32.partialorder %v2331_v16, -1e+10 }
 0x114   :  { %327 = vmin.xlane.f32.xlu2 %v326_v30  ;;  %3222 = vst [vmem:[#allocation20_spill] sm:$0xff] %v2490_v22 }
 0x116   :  { %v2400_v34 = vpop.xlane.xlu2 %342 }
 0x117   :  { %446 = vrot.lane.b32.xlu1 %v2156_v49, %s2004_s10  ;;  %v138_v49 = vpop.permute.xlu1 %137 }
 0x118   :  { %vm170_vm1 = vcmp.eq.s32.totalorder %v138_v49, %v2256_v47 }
 0x119   :  { %v2435_v9 = vsel %vm170_vm1, 1.0, %v3184_v53 }
 0x11a   :  { %v411_v32 = vsub.f32 %v2435_v9, %v2438_v10 }
 0x11e   :  { %v132_v39 = vpop.permute.xlu2 %131 }
 0x11f   :  { %vm168_vm13 = vcmp.eq.s32.totalorder %v132_v39, %v2256_v47  ;;  %v141_v14 = vpop.permute.xlu1 %140 }
 0x120   :  { %v2410_v44 = vsel %vm168_vm13, 1.0, %v3184_v53  ;;  %vm171_vm3 = vcmp.eq.s32.totalorder %v141_v14, %v2256_v47  ;;  %vm271_vm13 = vcmp.eq.s32.totalorder %v2317_v11, %v2256_v47 }
 0x121   :  { %v409_v26 = vsub.f32 %v2410_v44, %v2407_v42  ;;  %v2449_v55 = vsel %vm171_vm3, 1.0, %v3184_v53  ;;  %v2502_v43 = vsel %vm271_vm13, 1.0, %v3184_v53 }
 0x122   :  { %3215 = vst [vmem:[#allocation13_spill] sm:$0xff] %v2449_v55  ;;  %v412_v18 = vsub.f32 %v2449_v55, %v2452_v57 }
 0x123   :  { %1693 = vmatmul.msk.f32.gmra.mxu0 %vm484_vm5, %v409_v26  ;;  %3224 = vst [vmem:[#allocation22_spill] sm:$0xff] %v2502_v43 }
 0x126   :  { %v135_v46 = vpop.permute.xlu2 %134 }
 0x127   :  { %436 = vrot.lane.b32.xlu0 %v2065_v3, %s2004_s10  ;;  %vm169_vm0 = vcmp.eq.s32.totalorder %v135_v46, %v2256_v47  ;;  %v240_v50 = vpop.permute.xlu1 %239 }
 0x128   :  { %v2424_v59 = vsel %vm169_vm0, 1.0, %v3184_v53  ;;  %vm268_vm6 = vcmp.eq.s32.totalorder %v240_v50, %v2256_v47  ;;  %vm272_vm0 = vcmp.eq.s32.totalorder %v2325_v13, %v2256_v47 }
 0x129   :  { %v410_v62 = vsub.f32 %v2424_v59, %v2421_v35  ;;  %v2516_v49 = vsel %vm272_vm0, 1.0, %v3184_v53 }
 0x12a   :  { %3226 = vst [vmem:[#allocation24_spill] sm:$0xff] %v2516_v49 }
 0x12b   :  { %1694 = vmatmul.msk.f32.gmra.mxu0 %vm484_vm5, %v410_v62  ;;  %v159_v62 = vpop.permute.xlu0 %158 }
 0x12c   :  { %444 = vrot.lane.b32.xlu2 %v2131_v36, %s2004_s10  ;;  %vm177_vm2 = vcmp.eq.s32.totalorder %v159_v62, %v2256_v47 }
 0x12e   :  { %v147_v21 = vpop.permute.xlu2 %146 }
 0x12f   :  { %vm173_vm8 = vcmp.eq.s32.totalorder %v147_v21, %v2256_v47  ;;  %v243_v28 = vpop.permute.xlu1 %242 }
 0x130   :  { %vm269_vm9 = vcmp.eq.s32.totalorder %v243_v28, %v2256_v47 }
 0x131   :  { %v2478_v60 = vsel %vm269_vm9, 1.0, %v3184_v53  ;;  %vm367_vm9 = vcmp.gt.f32.partialorder %v2400_v34, -1e+10 }
 0x132   :  { %3220 = vst [vmem:[#allocation18_spill] sm:$0xff] %v2478_v60 }
 0x133   :  { %1695 = vmatmul.msk.f32.gmra.mxu0 %vm484_vm5, %v411_v32  ;;  %v2529_v32 = vsel %vm177_vm2, 1.0, %v3184_v53 }
 0x134   :  { %442 = vrot.lane.b32.xlu2 %v2076_v8, %s2004_s10  ;;  %v2462_v8 = vsel %vm268_vm6, 1.0, %v3184_v53  ;;  %3228 = vst [vmem:[#allocation26_spill] sm:$0xff] %v2529_v32 }
 0x135   :  { %3217 = vst [vmem:[#allocation15_spill] sm:$0xff] %v2462_v8  ;;  %v413_v27 = vsub.f32 %v2465_v7, %v2462_v8 }
 0x136   :  { %v150_v17 = vpop.permute.xlu2 %149 }
 0x137   :  { %vm174_vm10 = vcmp.eq.s32.totalorder %v150_v17, %v2256_v47  ;;  %v153_v29 = vpop.permute.xlu1 %152 }
 0x138   :  { %v2487_v31 = vsel %vm174_vm10, 1.0, %v3184_v53  ;;  %vm175_vm12 = vcmp.eq.s32.totalorder %v153_v29, %v2256_v47  ;;  %v2569_v29 = vpop.permute.xlu0 %466 }
 0x139   :  { %3221 = vst [vmem:[#allocation19_spill] sm:$0xff] %v2487_v31  ;;  %v415_v30 = vsub.f32 %v2487_v31, %v2490_v22  ;;  %v2499_v38 = vsel %vm175_vm12, 1.0, %v3184_v53 }
 0x13a   :  { %3223 = vst [vmem:[#allocation21_spill] sm:$0xff] %v2499_v38  ;;  %v416_v26 = vsub.f32 %v2499_v38, %v2502_v43  ;;  %v3231_v38 = vmov 0.0  }
 0x13b   :  { %1696 = vmatmul.msk.f32.gmra.mxu0 %vm484_vm5, %v412_v18 }
 0x13c   :  { %440 = vrot.lane.b32.xlu2 %v2055_v1, %s2004_s10  ;;  %v2475_v1 = vsel %vm173_vm8, 1.0, %v3184_v53 }
 0x13d   :  { %3219 = vst [vmem:[#allocation17_spill] sm:$0xff] %v2475_v1  ;;  %v414_v36 = vsub.f32 %v2475_v1, %v2478_v60 }
 0x13e   :  { %v162_v50 = vpop.permute.xlu2 %161 }
 0x13f   :  { %v156_v39 = vpop.permute.xlu1 %155  ;;  %vm178_vm3 = vcmp.eq.s32.totalorder %v162_v50, %v2256_v47 }
 0x140   :  { %vm176_vm14 = vcmp.eq.s32.totalorder %v156_v39, %v2256_v47  ;;  %v2540_v21 = vsel %vm178_vm3, 1.0, %v3184_v53  ;;  %v465_v39 = vpop.permute.xlu0 %464 }
 0x141   :  { %321 = vmin.xlane.f32.xlu1 %v320_v24  ;;  %v2513_v11 = vsel %vm176_vm14, 1.0, %v3184_v53  ;;  %3230 = vst [vmem:[#allocation28_spill] sm:$0xff] %v2540_v21 }
 0x142   :  { %3225 = vst [vmem:[#allocation23_spill] sm:$0xff] %v2513_v11  ;;  %v417_v14 = vsub.f32 %v2513_v11, %v2516_v49 }
 0x143   :  { %1697 = vmatmul.msk.f32.gmra.mxu0 %vm484_vm5, %v413_v27  ;;  %v2544_v27 = vpop.f32.mrf.mxu0 }
 0x146   :  { %v455_v5 = vpop.permute.xlu2 %454 }
 0x147   :  { %v255_v46 = vpop.permute.xlu1 %254 }
 0x148   :  { %vm273_vm1 = vcmp.eq.s32.totalorder %v255_v46, %v2256_v47  ;;  %v349_v62 = vpop.xlane.xlu0 %348 }
 0x149   :  { %v2526_v13 = vsel %vm273_vm1, 1.0, %v3184_v53  ;;  %vm369_vm6 = vcmp.gt.f32.partialorder %v349_v62, -1e+10 }
 0x14a   :  { %3227 = vst [vmem:[#allocation25_spill] sm:$0xff] %v2526_v13  ;;  %v418_v20 = vsub.f32 %v2529_v32, %v2526_v13  ;;  %v2587_v57 = vsel %vm369_vm6, 1.0, %v3231_v38 }
 0x14b   :  { %1698 = vmatmul.msk.f32.gmra.mxu0 %vm484_vm5, %v414_v36  ;;  %v2547_v28 = vpop.f32.mrf.mxu0  ;;  %3232 = vst [vmem:[#allocation29_spill] sm:$0xff] %v2587_v57 }
 0x14f   :  { %v258_v18 = vpop.permute.xlu1 %257 }
 0x153   :  { %1699 = vmatmul.msk.f32.gmra.mxu0 %vm484_vm5, %v415_v30 }
 0x157   :  { %v2561_v17 = vpop.f32.mrf.mxu0 }
 0x15a   :  { %438 = vrot.lane.b32.xlu1 %v2060_v2, %s2004_s10  ;;  %v308_v2 = vsel %vm307_vm15, %v2065_v3, inf  ;;  %vm274_vm15 = vcmp.eq.s32.totalorder %v258_v18, %v2256_v47  ;;  %v459_v18 = vpop.permute.xlu0 %458  ;;  %v453_v47 = vpop.permute.xlu2 %452 }
 0x15b   :  { %1700 = vmatmul.msk.f32.gmra.mxu0 %vm484_vm5, %v416_v26  ;;  %v2537_v3 = vsel %vm274_vm15, 1.0, %v3184_v53 }
 0x15c   :  { %3229 = vst [vmem:[#allocation27_spill] sm:$0xff] %v2537_v3  ;;  %v419_v24 = vsub.f32 %v2540_v21, %v2537_v3 }
 0x15f   :  { %v2567_v36 = vpop.f32.mrf.mxu0 }
 0x163   :  { %1701 = vmatmul.msk.f32.gmra.mxu0 %vm484_vm5, %v417_v14  ;;  %v352_v14 = vpop.xlane.xlu1 %351 }
 0x164   :  { %vm370_vm8 = vcmp.gt.f32.partialorder %v352_v14, -1e+10 }
 0x165   :  { %309 = vmin.xlane.f32.xlu2 %v308_v2  ;;  %v2604_v23 = vsel %vm370_vm8, 1.0, %v3231_v38  ;;  %vm1829_vm8 = vcmp.lt.s32.totalorder %v2289_v58, 0 }
 0x167   :  { %v2571_v30 = vpop.f32.mrf.mxu0 }
 0x16b   :  { %1702 = vmatmul.msk.f32.gmra.mxu0 %vm484_vm5, %v418_v20  ;;  %v346_v20 = vpop.xlane.xlu1 %345 }
 0x16c   :  { %vm368_vm7 = vcmp.gt.f32.partialorder %v346_v20, -1e+10 }
 0x16d   :  { %v2597_v55 = vsel %vm368_vm7, 1.0, %v3231_v38 }
 0x16e   :  { %3233 = vst [vmem:[#allocation30_spill] sm:$0xff] %v2597_v55 }
 0x173   :  { %1703 = vmatmul.msk.f32.gmra.mxu0 %vm484_vm5, %v419_v24  ;;  %v457_v24 = vpop.permute.xlu0 %456  ;;  %v461_v15 = vpop.permute.xlu1 %460 }
 0x17b   :  { %v337_v53 = vpop.xlane.xlu0 %336  ;;  %v2579_v13 = vpop.xlane.xlu1 %339 }
 0x17c   :  { %vm365_vm10 = vcmp.gt.f32.partialorder %v337_v53, -1e+10  ;;  %vm366_vm13 = vcmp.gt.f32.partialorder %v2579_v13, -1e+10 }
 0x17d   :  { %v2641_v13 = vsel %vm366_vm13, 1.0, %v3231_v38  ;;  %vm1839_vm13 = vcmp.lt.s32.totalorder %v2268_v51, 0 }
 0x183   :  { %v2581_v43 = vpop.permute.xlu0 %450  ;;  %v334_v21 = vpop.xlane.xlu1 %333 }
 0x184   :  { %vm364_vm12 = vcmp.gt.f32.partialorder %v334_v21, -1e+10 }
 0x187   :  { %v328_v32 = vpop.xlane.xlu2 %327 }
 0x188   :  { %vm362_vm14 = vcmp.gt.f32.partialorder %v328_v32, -1e+10 }
 0x18b   :  { %v2583_v60 = vpop.xlane.xlu0 %324  ;;  %v2589_v31 = vpop.xlane.xlu1 %330 }
 0x18c   :  { %vm361_vm0 = vcmp.gt.f32.partialorder %v2583_v60, -1e+10  ;;  %vm363_vm1 = vcmp.gt.f32.partialorder %v2589_v31, -1e+10 }
 0x18d   :  { %v2662_v31 = vsel %vm363_vm1, 1.0, %v3231_v38 }
 0x18f   :  { %v2591_v10 = vpop.permute.xlu2 %444 }
 0x193   :  { %v2594_v7 = vpop.xlane.xlu0 %318  ;;  %v449_v14 = vpop.permute.xlu1 %448 }
 0x194   :  { %vm359_vm2 = vcmp.gt.f32.partialorder %v2594_v7, -1e+10 }
 0x19b   :  { %v2617_v34 = vpop.xlane.xlu0 %315 }
 0x19c   :  { %vm358_vm15 = vcmp.gt.f32.partialorder %v2617_v34, -1e+10  ;;  %v563_v34 = vadd.f32 %v2571_v30, %v2591_v10 }
 0x1a0   :  { %v2573_v26 = vpop.f32.mrf.mxu0 }
 0x1a8   :  { %v2575_v46 = vpop.f32.mrf.mxu0 }
 0x1b0   :  { %v2577_v2 = vpop.f32.mrf.mxu0 }
 0x1b8   :  { %v574_v50 = vpop.f32.mrf.mxu0 }
 0x1c0   :  { %v577_v4 = vpop.f32.mrf.mxu0 }
 0x1c8   :  { %v580_v3 = vpop.f32.mrf.mxu0 }
 0x1d0   :  { %v583_v49 = vpop.f32.mrf.mxu0 }
 0x1d8   :  { %v586_v22 = vpop.f32.mrf.mxu0 }
 0x1d9   :  { %v587_v1 = vadd.f32 %v586_v22, %v461_v15  ;;  %v584_v15 = vadd.f32 %v583_v49, %v459_v18 }
 0x1e0   :  { %v589_v11 = vpop.f32.mrf.mxu0 }
 0x1e1   :  { %v590_v8 = vadd.f32 %v589_v11, %v2392_v33  ;;  %v2600_v33 = vmul.f32 %v2597_v55, %v587_v1  ;;  %v578_v1 = vadd.f32 %v577_v4, %v455_v5  ;;  %v443_v55 = vpop.permute.xlu2 %442 }
 0x1e3   :  { %v611_v35 = vmul.f32 %v2587_v57, %v590_v8  ;;  %v626_v22 = vmul.f32 %v2600_v33, %v2600_v33 }
 0x1e5   :  { %v627_v42 = vmul.f32 %v611_v35, %v611_v35  ;;  %v667_v53 = vsel %vm104_vm4, %v626_v22, 0.0  ;;  %v2632_v22 = vsel %vm364_vm12, 1.0, %v3231_v38  ;;  %vm1834_vm12 = vcmp.lt.s32.totalorder %v2274_v52, 0 }
 0x1e7   :  { %v670_v11 = vsel %vm104_vm4, %v627_v42, 0.0  ;;  %v2612_v42 = vsel %vm367_vm9, 1.0, %v3231_v38  ;;  %vm1844_vm9 = vcmp.lt.s32.totalorder %v2262_v48, 0 }
 0x1e8   :  { %v592_v62 = vpop.f32.mrf.mxu0  ;;  %671 = vadd.xlane.f32.xlu2 %v670_v11  ;;  %v609_v49 = vmul.f32 %v2612_v42, %v584_v15  ;;  %v2627_v11 = vsel %vm371_vm11, 1.0, %v3231_v38  ;;  %vm1824_vm11 = vcmp.lt.s32.totalorder %v2298_v63, 0 }
 0x1e9   :  { %v593_v20 = vadd.f32 %v592_v62, %v465_v39  ;;  %v2615_v39 = vsel %vm365_vm10, 1.0, %v3231_v38  ;;  %v575_v62 = vadd.f32 %v574_v50, %v453_v47  ;;  %v447_v47 = vpop.permute.xlu1 %446  ;;  %v441_v32 = vpop.permute.xlu2 %440  ;;  %vm1854_vm10 = vcmp.lt.s32.totalorder %v2243_v40, 0 }
 0x1ea   :  { %v2623_v4 = vmul.f32 %v2615_v39, %v578_v1  ;;  %v625_v15 = vmul.f32 %v609_v49, %v609_v49  ;;  %v569_v1 = vadd.f32 %v2575_v46, %v449_v14 }
 0x1eb   :  { %v612_v8 = vmul.f32 %v2604_v23, %v593_v20  ;;  %v581_v20 = vadd.f32 %v580_v3, %v457_v24  ;;  %v606_v3 = vmul.f32 %v2632_v22, %v575_v62  ;;  %v572_v62 = vadd.f32 %v2577_v2, %v2581_v43 }
 0x1ec   :  { %v623_v21 = vmul.f32 %v2623_v4, %v2623_v4  ;;  %v664_v46 = vsel %vm104_vm4, %v625_v15, 0.0  ;;  %v2666_v15 = vsel %vm359_vm2, 1.0, %v3231_v38 }
 0x1ed   :  { %v628_v57 = vmul.f32 %v612_v8, %v612_v8  ;;  %v608_v24 = vmul.f32 %v2641_v13, %v581_v20  ;;  %v622_v60 = vmul.f32 %v606_v3, %v606_v3 }
 0x1ef   :  { %v673_v18 = vsel %vm104_vm4, %v628_v57, 0.0  ;;  %v624_v20 = vmul.f32 %v608_v24, %v608_v24 }
 0x1f0   :  { %v595_v5 = vpop.f32.mrf.mxu0  ;;  %674 = vadd.xlane.f32.xlu0 %v673_v18  ;;  %668 = vadd.xlane.f32.xlu2 %v667_v53  ;;  %v658_v53 = vsel %vm104_vm4, %v623_v21, 0.0  ;;  %v605_v21 = vmul.f32 %v2662_v31, %v572_v62 }
 0x1f1   :  { %v596_v16 = vadd.f32 %v595_v5, %v2569_v29  ;;  %v2638_v29 = vsel %vm362_vm14, 1.0, %v3231_v38  ;;  %v2650_v5 = vpop.xlane.xlu0 %312  ;;  %v310_v2 = vpop.xlane.xlu2 %309 }
 0x1f2   :  { %v604_v14 = vmul.f32 %v2638_v29, %v569_v1  ;;  %v655_v1 = vsel %vm104_vm4, %v622_v60, 0.0  ;;  %vm356_vm6 = vcmp.gt.f32.partialorder %v310_v2, -1e+10  ;;  %vm357_vm7 = vcmp.gt.f32.partialorder %v2650_v5, -1e+10 }
 0x1f3   :  { %v613_v57 = vmul.f32 %v2627_v11, %v596_v16  ;;  %v566_v16 = vadd.f32 %v2573_v26, %v447_v47  ;;  %v322_v26 = vpop.xlane.xlu1 %321  ;;  %v621_v47 = vmul.f32 %v605_v21, %v605_v21  ;;  %v2698_v60 = vsel %vm357_vm7, 1.0, %v3231_v38 }
 0x1f4   :  { %v620_v7 = vmul.f32 %v604_v14, %v604_v14  ;;  %vm360_vm3 = vcmp.gt.f32.partialorder %v322_v26, -1e+10 }
 0x1f5   :  { %1109 = vmatpush.msra.mxu2 %v613_v57  ;;  %v629_v18 = vmul.f32 %v613_v57, %v613_v57  ;;  %v2659_v57 = vsel %vm361_vm0, 1.0, %v3231_v38 }
 0x1f6   :  { %v603_v43 = vmul.f32 %v2659_v57, %v566_v16 }
 0x1f7   :  { %1110 = vmatpush.msra.mxu2 %v612_v8  ;;  %v676_v50 = vsel %vm104_vm4, %v629_v18, 0.0  ;;  %v2006_v8 = vmov 3  }
 0x1f8   :  { %677 = vadd.xlane.f32.xlu1 %v676_v50  ;;  %665 = vadd.xlane.f32.xlu2 %v664_v46  ;;  %v619_v50 = vmul.f32 %v603_v43, %v603_v43  ;;  %v2678_v46 = vsel %vm358_vm15, 1.0, %v3231_v38 }
 0x1f9   :  { %659 = vadd.xlane.f32.xlu0 %v658_v53  ;;  %1111 = vmatpush.msra.mxu2 %v611_v35  ;;  %v560_v35 = vadd.f32 %v2567_v36, %v443_v55  ;;  %v649_v55 = vsel %vm104_vm4, %v620_v7, 0.0  ;;  %v437_v36 = vpop.permute.xlu0 %436 }
 0x1fa   :  { %1885 = vset.pattern.permute.xlu0 %v2006_v8  ;;  %1884 = vset.pattern.permute.xlu1 %v2006_v8  ;;  %v2686_v8 = vsel %vm356_vm6, 1.0, %v3231_v38 }
 0x1fb   :  { %1112 = vmatpush.msra.mxu2 %v2600_v33  ;;  %v661_v33 = vsel %vm104_vm4, %v624_v20, 0.0  ;;  %v601_v18 = vmul.f32 %v2666_v15, %v560_v35  ;;  %v439_v62 = vpop.permute.xlu1 %438 }
 0x1fd   :  { %1113 = vmatpush.msra.mxu2 %v609_v49  ;;  %v557_v49 = vadd.f32 %v2561_v17, %v441_v32  ;;  %v617_v53 = vmul.f32 %v601_v18, %v601_v18  ;;  %v652_v17 = vsel %vm104_vm4, %v621_v47, 0.0  ;;  %v646_v32 = vsel %vm104_vm4, %v619_v50, 0.0 }
 0x1fe   :  { %v1855_v50 = vceil.f32 %v2243_v40 }
 0x1ff   :  { %1114 = vmatpush.msra.mxu2 %v608_v24  ;;  %v2681_v24 = vsel %vm360_vm3, 1.0, %v3231_v38  ;;  %v600_v16 = vmul.f32 %v2678_v46, %v557_v49  ;;  %v640_v10 = vsel %vm104_vm4, %v617_v53, 0.0  ;;  %v1856_v53 = vfloor.f32 %v2243_v40 }
 0x200   :  { %662 = vadd.xlane.f32.xlu1 %v661_v33  ;;  %656 = vadd.xlane.f32.xlu2 %v655_v1  ;;  %v1830_v33 = vceil.f32 %v2289_v58  ;;  %v1831_v1 = vfloor.f32 %v2289_v58  ;;  %v1835_v40 = vceil.f32 %v2274_v52 }
 0x201   :  { %650 = vadd.xlane.f32.xlu0 %v649_v55  ;;  %1115 = vmatpush.msra.mxu2 %v2623_v4  ;;  %v551_v4 = vadd.f32 %v2544_v27, %v437_v36  ;;  %v554_v27 = vadd.f32 %v2547_v28, %v439_v62  ;;  %v1845_v55 = vceil.f32 %v2262_v48  ;;  %v1846_v36 = vfloor.f32 %v2262_v48 }
 0x202   :  { %v1826_v48 = vfloor.f32 %v2298_v63 }
 0x203   :  { %1116 = vmatpush.msra.mxu2 %v606_v3  ;;  %v602_v3 = vmul.f32 %v2681_v24, %v563_v34  ;;  %v598_v20 = vmul.f32 %v2686_v8, %v551_v4  ;;  %v599_v2 = vmul.f32 %v2698_v60, %v554_v27  ;;  %v1847_v49 = vsel %vm1844_vm9, %v1845_v55, %v1846_v36 }
 0x204   :  { %v1848_v47 = vcvt.f32.s32 %v1847_v49  ;;  %v1857_v34 = vsel %vm1854_vm10, %v1855_v50, %v1856_v53  ;;  %v1825_v4 = vceil.f32 %v2298_v63 }
 0x205   :  { %1117 = vmatpush.msra.mxu2 %v605_v21  ;;  %v618_v30 = vmul.f32 %v602_v3, %v602_v3  ;;  %v614_v35 = vmul.f32 %v598_v20, %v598_v20  ;;  %v615_v28 = vmul.f32 %v599_v2, %v599_v2  ;;  %v1832_v21 = vsel %vm1829_vm8, %v1830_v33, %v1831_v1 }
 0x206   :  { %v1858_v58 = vcvt.f32.s32 %v1857_v34  ;;  %v1850_v34 = vceil.f32 %v2248_v41 }
 0x207   :  { %1118 = vmatpush.msra.mxu2 %v604_v14  ;;  %v616_v14 = vmul.f32 %v600_v16, %v600_v16  ;;  %v643_v7 = vsel %vm104_vm4, %v618_v30, 0.0  ;;  %v631_v5 = vsel %vm104_vm4, %v614_v35, 0.0 }
 0x208   :  { %653 = vadd.xlane.f32.xlu1 %v652_v17  ;;  %647 = vadd.xlane.f32.xlu2 %v646_v32  ;;  %v1827_v17 = vsel %vm1824_vm11, %v1825_v4, %v1826_v48 }
 0x209   :  { %641 = vadd.xlane.f32.xlu0 %v640_v10  ;;  %1119 = vmatpush.msra.mxu2 %v603_v43  ;;  %v637_v26 = vsel %vm104_vm4, %v616_v14, 0.0  ;;  %v634_v43 = vsel %vm104_vm4, %v615_v28, 0.0  ;;  %v1828_v32 = vcvt.f32.s32 %v1827_v17 }
 0x20b   :  { %1120 = vmatpush.msra.mxu2 %v602_v3 }
 0x20d   :  { %1121 = vmatpush.msra.mxu2 %v601_v18  ;;  %v1833_v18 = vcvt.f32.s32 %v1832_v21 }
 0x20f   :  { %1122 = vmatpush.msra.mxu2 %v600_v16 }
 0x210   :  { %644 = vadd.xlane.f32.xlu1 %v643_v7  ;;  %638 = vadd.xlane.f32.xlu2 %v637_v26 }
 0x211   :  { %632 = vadd.xlane.f32.xlu0 %v631_v5  ;;  %1123 = vmatpush.msra.mxu2 %v599_v2 }
 0x213   :  { %1124 = vmatpush.msra.mxu2 %v598_v20 }
 0x218   :  { %635 = vadd.xlane.f32.xlu1 %v634_v43  ;;  %v2753_v43 = vld [vmem:[%s3174_s2] ss:$0 sm:$0xff] }
 0x225   :  { %1181 = vperm.xlu0 %1885, %v1833_v18  }
 0x22d   :  { %1190 = vperm.xlu0 %1885, %v1848_v47  }
 0x231   :  { %1178 = vperm.xlu1 %1884, %v1828_v32  }
 0x235   :  { %1196 = vperm.xlu0 %1885, %v1858_v58  }
 0x239   :  { %979 = vxpose.xlu2.b32.start [1/16] (narrow) %v2277_v54, 64  ;;  %v1836_v54 = vfloor.f32 %v2274_v52 }
 0x23b   :  { %v1837_v63 = vsel %vm1834_vm12, %v1835_v40, %v1836_v54 }
 0x241   :  { %980 = vxpose.xlu2.b32.cont [2/16] (narrow) %v2305_v0, 64 }
 0x249   :  { %981 = vxpose.xlu2.b32.cont [3/16] (narrow) %v2346_v61, 64  ;;  %v1838_v61 = vcvt.f32.s32 %v1837_v63 }
 0x24b   :  { %1184 = vperm.xlu1 %1884, %v1838_v61  }
 0x251   :  { %982 = vxpose.xlu2.b32.cont [4/16] (narrow) %v2357_v45, 64  ;;  %v1841_v45 = vfloor.f32 %v2268_v51 }
 0x257   :  { %1077 = vxpose.xlu0.b32.start [1/16] (narrow) %v2284_v56, 64  ;;  %v1840_v56 = vceil.f32 %v2268_v51 }
 0x259   :  { %983 = vxpose.xlu2.b32.cont [5/16] (narrow) %v2375_v25, 64 }
 0x25b   :  { %v672_v0 = vpop.xlane.xlu2 %671 }
 0x25c   :  { %1894 = vrsqrt.f32 %v672_v0  ;;  %vm842_vm14 = vcmp.eq.f32.partialorder %v672_v0, inf  ;;  %vm844_vm0 = vcmp.eq.f32.partialorder %v672_v0, 0.0 }
 0x25f   :  { %1078 = vxpose.xlu0.b32.cont [2/16] (narrow) %v2308_v6, 64 }
 0x261   :  { %984 = vxpose.xlu2.b32.cont [6/16] (narrow) %v2410_v44, 64  ;;  %v1842_v44 = vsel %vm1839_vm13, %v1840_v56, %v1841_v45 }
 0x262   :  { %v1895_v3 = vpop.eup %1894  ;;  %v1843_v20 = vcvt.f32.s32 %v1842_v44  ;;  %v3234_v44 = vld [vmem:[#allocation9_spill] sm:$0xff] }
 0x263   :  { %v836_v25 = vmul.f32 %v1895_v3, %v672_v0  ;;  %v2730_v16 = vpop.xlane.xlu0 %674  ;;  %v2732_v62 = vpop.xlane.xlu2 %668 }
 0x264   :  { %1896 = vrsqrt.f32 %v2730_v16  ;;  %1187 = vperm.xlu1 %1884, %v1843_v20   ;;  %vm854_vm1 = vcmp.eq.f32.partialorder %v2730_v16, inf  ;;  %vm830_vm2 = vcmp.eq.f32.partialorder %v2732_v62, inf  ;;  %vm856_vm15 = vcmp.eq.f32.partialorder %v2730_v16, 0.0 }
 0x265   :  { %v837_v52 = vmul.f32 %v1895_v3, %v836_v25  ;;  %1898 = vrsqrt.f32 %v2732_v62  ;;  %v833_v25 = vand.u32 2147483648, %v2732_v62  ;;  %vm832_vm7 = vcmp.eq.f32.partialorder %v2732_v62, 0.0 }
 0x267   :  { %v838_v6 = vmul.f32 0.5, %v837_v52  ;;  %1079 = vxpose.xlu0.b32.cont [3/16] (narrow) %v2343_v37, 64 }
 0x269   :  { %v839_v10 = vsub.f32 1.5, %v838_v6  ;;  %985 = vxpose.xlu2.b32.cont [7/16] (narrow) %v2424_v59, 64  ;;  %v845_v59 = vand.u32 2147483648, %v672_v0 }
 0x26a   :  { %v1897_v27 = vpop.eup %1896 }
 0x26b   :  { %v1899_v30 = vpop.eup %1898  ;;  %v840_v14 = vmul.f32 %v1895_v3, %v839_v10  ;;  %v848_v35 = vmul.f32 %v1897_v27, %v2730_v16  ;;  %v2740_v7 = vpop.xlane.xlu1 %677 }
 0x26c   :  { %v2742_v26 = vpop.xlane.xlu2 %665  ;;  %v824_v51 = vmul.f32 %v1899_v30, %v2732_v62  ;;  %1900 = vrsqrt.f32 %v2740_v7  ;;  %v2746_v37 = vpop.xlane.xlu0 %659  ;;  %vm866_vm3 = vcmp.eq.f32.partialorder %v2740_v7, inf  ;;  %vm868_vm6 = vcmp.eq.f32.partialorder %v2740_v7, 0.0 }
 0x26d   :  { %v841_v2 = vmul.f32 %v840_v14, %v672_v0  ;;  %v849_v5 = vmul.f32 %v1897_v27, %v848_v35  ;;  %1902 = vrsqrt.f32 %v2742_v26  ;;  %vm818_vm9 = vcmp.eq.f32.partialorder %v2742_v26, inf }
 0x26e   :  { %v825_v28 = vmul.f32 %v1899_v30, %v824_v51  ;;  %1904 = vrsqrt.f32 %v2746_v37  ;;  %v797_v51 = vand.u32 2147483648, %v2746_v37  ;;  %vm820_vm11 = vcmp.eq.f32.partialorder %v2742_v26, 0.0 }
 0x26f   :  { %v850_v33 = vmul.f32 0.5, %v849_v5  ;;  %1080 = vxpose.xlu0.b32.cont [4/16] (narrow) %v2360_v19, 64  ;;  %v843_v1 = vsel %vm842_vm14, %v672_v0, %v841_v2  ;;  %v857_v0 = vand.u32 2147483648, %v2730_v16  ;;  %v3235_v2 = vld [vmem:[#allocation13_spill] sm:$0xff]  ;;  %vm794_vm12 = vcmp.eq.f32.partialorder %v2746_v37, inf }
 0x270   :  { %v826_v21 = vmul.f32 0.5, %v825_v28  ;;  %v846_v18 = vsel %vm844_vm0, %v845_v59, %v843_v1  ;;  %vm796_vm14 = vcmp.eq.f32.partialorder %v2746_v37, 0.0 }
 0x271   :  { %v851_v55 = vsub.f32 1.5, %v850_v33  ;;  %986 = vxpose.xlu2.b32.cont [8/16] (narrow) %v2435_v9, 64  ;;  %v888_v47 = vsub.f32 %v846_v18, %v2753_v43  ;;  %v1851_v9 = vfloor.f32 %v2248_v41 }
 0x272   :  { %v1901_v36 = vpop.eup %1900  ;;  %v827_v32 = vsub.f32 1.5, %v826_v21 }
 0x273   :  { %v1903_v50 = vpop.eup %1902  ;;  %v852_v58 = vmul.f32 %v1897_v27, %v851_v55  ;;  %v860_v19 = vmul.f32 %v1901_v36, %v2740_v7  ;;  %v2762_v4 = vpop.xlane.xlu1 %662  ;;  %v904_v45 = vmul.f32 %v888_v47, %v888_v47  ;;  %v821_v27 = vand.u32 2147483648, %v2742_v26 }
 0x274   :  { %v2764_v48 = vpop.xlane.xlu2 %656  ;;  %v1905_v17 = vpop.eup %1904  ;;  %v812_v40 = vmul.f32 %v1903_v50, %v2742_v26  ;;  %1906 = vrsqrt.f32 %v2762_v4  ;;  %v828_v20 = vmul.f32 %v1899_v30, %v827_v32  ;;  %v869_v47 = vand.u32 2147483648, %v2740_v7 }
 0x275   :  { %v2769_v54 = vpop.xlane.xlu0 %650  ;;  %v861_v63 = vmul.f32 %v1901_v36, %v860_v19  ;;  %v788_v61 = vmul.f32 %v1905_v17, %v2746_v37  ;;  %v853_v3 = vmul.f32 %v852_v58, %v2730_v16  ;;  %1908 = vrsqrt.f32 %v2764_v48 }
 0x276   :  { %v813_v56 = vmul.f32 %v1903_v50, %v812_v40  ;;  %1910 = vrsqrt.f32 %v2769_v54  ;;  %v920_v28 = vmul.f32 -1.0, %v904_v45  ;;  %v829_v19 = vmul.f32 %v828_v20, %v2732_v62 }
 0x277   :  { %v862_v52 = vmul.f32 0.5, %v861_v63  ;;  %v789_v6 = vmul.f32 %v1905_v17, %v788_v61  ;;  %1081 = vxpose.xlu0.b32.cont [5/16] (narrow) %v3234_v44, 64  ;;  %v855_v30 = vsel %vm854_vm1, %v2730_v16, %v853_v3  ;;  %v809_v32 = vand.u32 2147483648, %v2762_v4 }
 0x278   :  { %v814_v10 = vmul.f32 0.5, %v813_v56  ;;  %v858_v45 = vsel %vm856_vm15, %v857_v0, %v855_v30  ;;  %v949_v44 = vmul.f32 1.442695, %v920_v28  ;;  %v2814_v16 = vsel %vm830_vm2, %v2732_v62, %v829_v19 }
 0x279   :  { %v863_v14 = vsub.f32 1.5, %v862_v52  ;;  %v790_v35 = vmul.f32 0.5, %v789_v6  ;;  %987 = vxpose.xlu2.b32.cont [9/16] (narrow) %v3235_v2, 64  ;;  %v3236_v2 = vld [vmem:[#allocation10_spill] sm:$0xff]  ;;  %vm806_vm10 = vcmp.eq.f32.partialorder %v2762_v4, inf  ;;  %vm808_vm13 = vcmp.eq.f32.partialorder %v2762_v4, 0.0 }
 0x27a   :  { %v1907_v5 = vpop.eup %1906  ;;  %v815_v59 = vsub.f32 1.5, %v814_v10  ;;  %v834_v41 = vsel %vm832_vm7, %v833_v25, %v2814_v16  ;;  %v3241_v16 = vld [vmem:[#allocation12_spill] sm:$0xff]  ;;  %vm782_vm0 = vcmp.eq.f32.partialorder %v2764_v48, inf  ;;  %vm758_vm2 = vcmp.eq.f32.partialorder %v2769_v54, inf }
 0x27b   :  { %v864_v33 = vmul.f32 %v1901_v36, %v863_v14  ;;  %v791_v1 = vsub.f32 1.5, %v790_v35  ;;  %v800_v21 = vmul.f32 %v1907_v5, %v2762_v4  ;;  %v2790_v18 = vpop.xlane.xlu1 %653  ;;  %v1909_v58 = vpop.eup %1908  ;;  %v3240_v35 = vld [vmem:[#allocation29_spill] sm:$0xff] }
 0x27c   :  { %v2792_v55 = vpop.xlane.xlu2 %647  ;;  %1912 = vrsqrt.f32 %v2790_v18  ;;  %v1911_v36 = vpop.eup %1910  ;;  %v776_v56 = vmul.f32 %v1909_v58, %v2764_v48  ;;  %v816_v52 = vmul.f32 %v1903_v50, %v815_v59  ;;  %v3237_v59 = vld [vmem:[#allocation16_spill] sm:$0xff]  ;;  %vm770_vm1 = vcmp.eq.f32.partialorder %v2790_v18, inf }
 0x27d   :  { %v2799_v63 = vpop.xlane.xlu0 %641  ;;  %v865_v61 = vmul.f32 %v864_v33, %v2740_v7  ;;  %v801_v3 = vmul.f32 %v1907_v5, %v800_v21  ;;  %v752_v6 = vmul.f32 %v1911_v36, %v2769_v54  ;;  %1914 = vrsqrt.f32 %v2792_v55 }
 0x27e   :  { %v792_v20 = vmul.f32 %v1905_v17, %v791_v1  ;;  %v777_v14 = vmul.f32 %v1909_v58, %v776_v56  ;;  %1916 = vrsqrt.f32 %v2799_v63  ;;  %v889_v21 = vsub.f32 %v858_v45, %v2753_v43 }
 0x27f   :  { %v802_v10 = vmul.f32 0.5, %v801_v3  ;;  %1082 = vxpose.xlu0.b32.cont [6/16] (narrow) %v3236_v2, 64  ;;  %v753_v33 = vmul.f32 %v1911_v36, %v752_v6  ;;  %v867_v30 = vsel %vm866_vm3, %v2740_v7, %v865_v61  ;;  %v2822_v1 = vmul.f32 %v816_v52, %v2742_v26 }
 0x280   :  { %v778_v0 = vmul.f32 0.5, %v777_v14  ;;  %v870_v56 = vsel %vm868_vm6, %v869_v47, %v867_v30  ;;  %1918 = vpow2.f32 %v949_v44  ;;  %v2827_v19 = vmul.f32 %v792_v20, %v2746_v37 }
 0x281   :  { %v803_v50 = vsub.f32 1.5, %v802_v10  ;;  %988 = vxpose.xlu2.b32.cont [10/16] (narrow) %v3237_v59, 64  ;;  %v754_v3 = vmul.f32 0.5, %v753_v33  ;;  %v890_v59 = vsub.f32 %v870_v56, %v2753_v43  ;;  %v905_v53 = vmul.f32 %v889_v21, %v889_v21  ;;  %v3239_v10 = vld [vmem:[#allocation17_spill] sm:$0xff] }
 0x282   :  { %v1913_v28 = vpop.eup %1912  ;;  %v779_v45 = vsub.f32 1.5, %v778_v0  ;;  %vm746_vm15 = vcmp.eq.f32.partialorder %v2792_v55, inf  ;;  %vm784_vm6 = vcmp.eq.f32.partialorder %v2764_v48, 0.0  ;;  %vm722_vm7 = vcmp.eq.f32.partialorder %v2799_v63, inf }
 0x283   :  { %v764_v6 = vmul.f32 %v1913_v28, %v2790_v18  ;;  %v2831_v14 = vpop.xlane.xlu1 %644  ;;  %v1915_v52 = vpop.eup %1914  ;;  %v804_v2 = vmul.f32 %v1907_v5, %v803_v50  ;;  %v755_v33 = vsub.f32 1.5, %v754_v3  ;;  %v1974_v5 = vld [vmem:[%s3173_s1 + $0x28] sm:$0xff] }
 0x284   :  { %v2833_v61 = vpop.xlane.xlu2 %638  ;;  %1920 = vrsqrt.f32 %v2831_v14  ;;  %v780_v47 = vmul.f32 %v1909_v58, %v779_v45  ;;  %v740_v20 = vmul.f32 %v1915_v52, %v2792_v55  ;;  %v1917_v30 = vpop.eup %1916  ;;  %vm1849_vm8 = vcmp.lt.s32.totalorder %v1974_v5, 0 }
 0x285   :  { %v765_v44 = vmul.f32 %v1913_v28, %v764_v6  ;;  %v2839_v0 = vpop.xlane.xlu0 %632  ;;  %v756_v49 = vmul.f32 %v1911_v36, %v755_v33  ;;  %1922 = vrsqrt.f32 %v2833_v61  ;;  %v716_v3 = vmul.f32 %v1917_v30, %v2799_v63  ;;  %v3238_v6 = vld [vmem:[#allocation11_spill] sm:$0xff] }
 0x286   :  { %v741_v50 = vmul.f32 %v1915_v52, %v740_v20  ;;  %v1919_v56 = vpop.eup %1918  ;;  %v805_v36 = vmul.f32 %v804_v2, %v2762_v4  ;;  %v2852_v21 = vmul.f32 %v780_v47, %v2764_v48  ;;  %1924 = vrsqrt.f32 %v2839_v0 }
 0x287   :  { %v766_v58 = vmul.f32 0.5, %v765_v44  ;;  %1083 = vxpose.xlu0.b32.cont [7/16] (narrow) %v3238_v6, 64  ;;  %v717_v7 = vmul.f32 %v1917_v30, %v716_v3  ;;  %v906_v45 = vmul.f32 %v890_v59, %v890_v59  ;;  %v2860_v2 = vmul.f32 %v756_v49, %v2769_v54 }
 0x288   :  { %v742_v20 = vmul.f32 0.5, %v741_v50  ;;  %v921_v47 = vmul.f32 -1.0, %v905_v53  ;;  %v2863_v17 = vmul.f32 %v1919_v56, %v3240_v35  ;;  %vm734_vm3 = vcmp.eq.f32.partialorder %v2831_v14, inf }
 0x289   :  { %v767_v44 = vsub.f32 1.5, %v766_v58  ;;  %989 = vxpose.xlu2.b32.cont [11/16] (narrow) %v3239_v10, 64  ;;  %v1852_v58 = vsel %vm1849_vm8, %v1850_v34, %v1851_v9  ;;  %v718_v50 = vmul.f32 0.5, %v717_v7  ;;  %v922_v35 = vmul.f32 -1.0, %v906_v45 }
 0x28a   :  { %v1921_v6 = vpop.eup %1920  ;;  %v743_v59 = vsub.f32 1.5, %v742_v20  ;;  %v951_v20 = vmul.f32 1.442695, %v921_v47  ;;  %v1853_v45 = vcvt.f32.s32 %v1852_v58  ;;  %v819_v47 = vsel %vm818_vm9, %v2742_v26, %v2822_v1 }
 0x28b   :  { %v768_v10 = vmul.f32 %v1913_v28, %v767_v44  ;;  %v728_v3 = vmul.f32 %v1921_v6, %v2831_v14  ;;  %v2872_v33 = vpop.xlane.xlu1 %635  ;;  %v1923_v49 = vpop.eup %1922  ;;  %v719_v28 = vsub.f32 1.5, %v718_v50  ;;  %v953_v44 = vmul.f32 1.442695, %v922_v35  ;;  %v3242_v50 = vld [vmem:[#allocation19_spill] sm:$0xff] }
 0x28c   :  { %1926 = vrsqrt.f32 %v2872_v33  ;;  %v744_v9 = vmul.f32 %v1915_v52, %v743_v59  ;;  %v1925_v5 = vpop.eup %1924  ;;  %v704_v56 = vmul.f32 %v1923_v49, %v2833_v61  ;;  %1193 = vperm.xlu1 %1884, %v1853_v45   ;;  %v822_v1 = vsel %vm820_vm11, %v821_v27, %v819_v47 }
 0x28d   :  { %v2883_v34 = vmul.f32 %v768_v10, %v2790_v18  ;;  %v729_v7 = vmul.f32 %v1921_v6, %v728_v3  ;;  %v720_v40 = vmul.f32 %v1917_v30, %v719_v28  ;;  %v680_v25 = vmul.f32 %v1925_v5, %v2839_v0 }
 0x28e   :  { %v2888_v53 = vmul.f32 %v744_v9, %v2792_v55  ;;  %v705_v52 = vmul.f32 %v1923_v49, %v704_v56  ;;  %1928 = vpow2.f32 %v953_v44  ;;  %v887_v10 = vsub.f32 %v834_v41, %v2753_v43 }
 0x28f   :  { %v730_v62 = vmul.f32 0.5, %v729_v7  ;;  %1084 = vxpose.xlu0.b32.cont [8/16] (narrow) %v3241_v16, 64  ;;  %v2900_v30 = vmul.f32 %v720_v40, %v2799_v63  ;;  %v681_v59 = vmul.f32 %v1925_v5, %v680_v25  ;;  %1930 = vpow2.f32 %v951_v20 }
 0x290   :  { %v706_v35 = vmul.f32 0.5, %v705_v52  ;;  %v903_v41 = vmul.f32 %v887_v10, %v887_v10  ;;  %v807_v9 = vsel %vm806_vm10, %v2762_v4, %v805_v36  ;;  %v886_v56 = vsub.f32 %v822_v1, %v2753_v43 }
 0x291   :  { %v731_v58 = vsub.f32 1.5, %v730_v62  ;;  %990 = vxpose.xlu2.b32.cont [12/16] (narrow) %v3242_v50, 64  ;;  %v682_v28 = vmul.f32 0.5, %v681_v59  ;;  %v810_v26 = vsel %vm808_vm13, %v809_v32, %v807_v9  ;;  %v795_v27 = vsel %vm794_vm12, %v2746_v37, %v2827_v19  ;;  %v3243_v59 = vld [vmem:[#allocation14_spill] sm:$0xff] }
 0x292   :  { %v1927_v3 = vpop.eup %1926  ;;  %v707_v44 = vsub.f32 1.5, %v706_v35  ;;  %v919_v20 = vmul.f32 -1.0, %v903_v41  ;;  %v902_v62 = vmul.f32 %v886_v56, %v886_v56  ;;  %v885_v10 = vsub.f32 %v810_v26, %v2753_v43 }
 0x293   :  { %v732_v40 = vmul.f32 %v1921_v6, %v731_v58  ;;  %v692_v7 = vmul.f32 %v1927_v3, %v2872_v33  ;;  %v683_v6 = vsub.f32 1.5, %v682_v28  ;;  %v798_v4 = vsel %vm796_vm14, %v797_v51, %v795_v27  ;;  %v3244_v51 = vld [vmem:[#allocation21_spill] sm:$0xff] }
 0x294   :  { %v1929_v25 = vpop.eup %1928  ;;  %v708_v16 = vmul.f32 %v1923_v49, %v707_v44  ;;  %v947_v52 = vmul.f32 1.442695, %v919_v20  ;;  %v918_v50 = vmul.f32 -1.0, %v902_v62  ;;  %v901_v41 = vmul.f32 %v885_v10, %v885_v10 }
 0x295   :  { %v2922_v36 = vmul.f32 %v732_v40, %v2831_v14  ;;  %v693_v45 = vmul.f32 %v1927_v3, %v692_v7  ;;  %v1931_v32 = vpop.eup %1930  ;;  %v684_v19 = vmul.f32 %v1925_v5, %v683_v6  ;;  %v970_v58 = vmul.f32 %v1929_v25, %v2627_v11 }
 0x296   :  { %v2933_v35 = vmul.f32 %v708_v16, %v2833_v61  ;;  %v969_v49 = vmul.f32 %v1931_v32, %v2604_v23  ;;  %1932 = vpow2.f32 %v947_v52  ;;  %v945_v5 = vmul.f32 1.442695, %v918_v50  ;;  %v3248_v16 = vld [vmem:[#allocation30_spill] sm:$0xff] }
 0x297   :  { %v694_v47 = vmul.f32 0.5, %v693_v45  ;;  %1085 = vxpose.xlu0.b32.cont [9/16] (narrow) %v3243_v59, 64  ;;  %v2937_v1 = vmul.f32 %v684_v19, %v2839_v0  ;;  %1011 = vmatpush.msra.mxu1 %v970_v58  ;;  %v884_v11 = vsub.f32 %v798_v4, %v2753_v43  ;;  %v917_v9 = vmul.f32 -1.0, %v901_v41  ;;  %v3249_v4 = vld [vmem:[#allocation15_spill] sm:$0xff] }
 0x298   :  { %v783_v23 = vsel %vm782_vm0, %v2764_v48, %v2852_v21  ;;  %v771_v40 = vsel %vm770_vm1, %v2790_v18, %v2883_v34  ;;  %1934 = vpow2.f32 %v945_v5  ;;  %v3245_v56 = vand.u32 2147483648, %v2764_v48  ;;  %v3250_v58 = vld [vmem:[#allocation23_spill] sm:$0xff] }
 0x299   :  { %v695_v37 = vsub.f32 1.5, %v694_v47  ;;  %991 = vxpose.xlu2.b32.cont [13/16] (narrow) %v3244_v51, 64  ;;  %1012 = vmatpush.msra.mxu1 %v969_v49  ;;  %v900_v7 = vmul.f32 %v884_v11, %v884_v11  ;;  %v943_v20 = vmul.f32 1.442695, %v917_v9  ;;  %vm772_vm8 = vcmp.eq.f32.partialorder %v2790_v18, 0.0 }
 0x29a   :  { %v786_v44 = vsel %vm784_vm6, %v3245_v56, %v783_v23  ;;  %v759_v21 = vsel %vm758_vm2, %v2769_v54, %v2860_v2  ;;  %vm710_vm9 = vcmp.eq.f32.partialorder %v2833_v61, inf  ;;  %vm760_vm10 = vcmp.eq.f32.partialorder %v2769_v54, 0.0 }
 0x29b   :  { %v696_v28 = vmul.f32 %v1927_v3, %v695_v37  ;;  %v883_v26 = vsub.f32 %v786_v44, %v2753_v43  ;;  %1013 = vmatpush.msra.mxu1 %v2863_v17  ;;  %v916_v48 = vmul.f32 -1.0, %v900_v7  ;;  %v3246_v3 = vand.u32 2147483648, %v2790_v18 }
 0x29c   :  { %v1933_v6 = vpop.eup %1932  ;;  %1936 = vpow2.f32 %v943_v20  ;;  %v3247_v2 = vand.u32 2147483648, %v2769_v54  ;;  %v747_v18 = vsel %vm746_vm15, %v2792_v55, %v2888_v53  ;;  %vm698_vm11 = vcmp.eq.f32.partialorder %v2872_v33, inf  ;;  %v1975_v54 = vld [vmem:[%s3173_s1 + $0x38] sm:$0xff] }
 0x29d   :  { %v2962_v34 = vmul.f32 %v696_v28, %v2872_v33  ;;  %v774_v27 = vsel %vm772_vm8, %v3246_v3, %v771_v40  ;;  %v899_v45 = vmul.f32 %v883_v26, %v883_v26  ;;  %v967_v52 = vmul.f32 %v1933_v6, %v3248_v16 }
 0x29e   :  { %v882_v62 = vsub.f32 %v774_v27, %v2753_v43  ;;  %v762_v25 = vsel %vm760_vm10, %v3247_v2, %v759_v21  ;;  %v941_v10 = vmul.f32 1.442695, %v916_v48  ;;  %vm748_vm12 = vcmp.eq.f32.partialorder %v2792_v55, 0.0  ;;  %v1935_v47 = vpop.eup %1934 }
 0x29f   :  { %1086 = vxpose.xlu0.b32.cont [10/16] (narrow) %v3249_v4, 64  ;;  %v881_v17 = vsub.f32 %v762_v25, %v2753_v43  ;;  %v915_v32 = vmul.f32 -1.0, %v899_v45  ;;  %vm1859_vm13 = vcmp.lt.s32.totalorder %v1975_v54, 0  ;;  %vm686_vm14 = vcmp.eq.f32.partialorder %v2839_v0, inf  ;;  %1014 = vmatpush.msra.mxu1 %v967_v52 }
 0x2a0   :  { %v898_v19 = vmul.f32 %v882_v62, %v882_v62  ;;  %1938 = vpow2.f32 %v941_v10  ;;  %v3251_v53 = vand.u32 2147483648, %v2792_v55  ;;  %v3252_v49 = vfloor.f32 %v2235_v12 }
 0x2a1   :  { %992 = vxpose.xlu2.b32.cont [14/16] (narrow) %v3250_v58, 64  ;;  %v897_v59 = vmul.f32 %v881_v17, %v881_v17  ;;  %v3253_v41 = vceil.f32 %v2235_v12  ;;  %v966_v51 = vmul.f32 %v1935_v47, %v2612_v42  ;;  %v939_v5 = vmul.f32 1.442695, %v915_v32 }
 0x2a2   :  { %v750_v50 = vsel %vm748_vm12, %v3251_v53, %v747_v18  ;;  %v914_v11 = vmul.f32 -1.0, %v898_v19  ;;  %v735_v28 = vsel %vm734_vm3, %v2831_v14, %v2922_v36  ;;  %vm736_vm0 = vcmp.eq.f32.partialorder %v2831_v14, 0.0  ;;  %v1937_v55 = vpop.eup %1936 }
 0x2a3   :  { %v1862_v37 = vsel %vm1859_vm13, %v3253_v41, %v3252_v49  ;;  %v880_v9 = vsub.f32 %v750_v50, %v2753_v43  ;;  %v913_v23 = vmul.f32 -1.0, %v897_v59  ;;  %1015 = vmatpush.msra.mxu1 %v966_v51  ;;  %1940 = vpow2.f32 %v939_v5  ;;  %v3261_v51 = vld [vmem:[#allocation20_spill] sm:$0xff] }
 0x2a4   :  { %v1863_v40 = vcvt.f32.s32 %v1862_v37  ;;  %v937_v12 = vmul.f32 1.442695, %v914_v11  ;;  %v3254_v42 = vand.u32 2147483648, %v2831_v14  ;;  %v965_v44 = vmul.f32 %v1937_v55, %v2641_v13  ;;  %v3255_v13 = vld [vmem:[#allocation18_spill] sm:$0xff] }
 0x2a5   :  { %v896_v7 = vmul.f32 %v880_v9, %v880_v9  ;;  %v935_v20 = vmul.f32 1.442695, %v913_v23  ;;  %v723_v36 = vsel %vm722_vm7, %v2799_v63, %v2900_v30  ;;  %vm724_vm1 = vcmp.eq.f32.partialorder %v2799_v63, 0.0  ;;  %v3262_v9 = vld [vmem:[#allocation28_spill] sm:$0xff] }
 0x2a6   :  { %v738_v56 = vsel %vm736_vm0, %v3254_v42, %v735_v28  ;;  %1199 = vperm.xlu1 %1884, %v1863_v40   ;;  %1942 = vpow2.f32 %v937_v12  ;;  %v711_v14 = vsel %vm710_vm9, %v2833_v61, %v2933_v35  ;;  %v1939_v48 = vpop.eup %1938  ;;  %1016 = vmatpush.msra.mxu1 %v965_v44  ;;  %v3256_v27 = vand.u32 2147483648, %v2799_v63  ;;  %v3258_v35 = vld [vmem:[#allocation26_spill] sm:$0xff] }
 0x2a7   :  { %v879_v26 = vsub.f32 %v738_v56, %v2753_v43  ;;  %v912_v21 = vmul.f32 -1.0, %v896_v7  ;;  %1944 = vpow2.f32 %v935_v20  ;;  %1087 = vxpose.xlu0.b32.cont [11/16] (narrow) %v3255_v13, 64  ;;  %vm712_vm2 = vcmp.eq.f32.partialorder %v2833_v61, 0.0  ;;  %v3263_v56 = vld [vmem:[#allocation22_spill] sm:$0xff] }
 0x2a8   :  { %v726_v6 = vsel %vm724_vm1, %v3256_v27, %v723_v36  ;;  %v964_v30 = vmul.f32 %v1939_v48, %v2615_v39  ;;  %v3257_v2 = vand.u32 2147483648, %v2833_v61  ;;  %v699_v63 = vsel %vm698_vm11, %v2872_v33, %v2962_v34  ;;  %v3264_v36 = vld [vmem:[#allocation24_spill] sm:$0xff]  ;;  %v3266_v48 = vld [vmem:[#allocation25_spill] sm:$0xff] }
 0x2a9   :  { %v895_v3 = vmul.f32 %v879_v26, %v879_v26  ;;  %v933_v45 = vmul.f32 1.442695, %v912_v21  ;;  %v878_v62 = vsub.f32 %v726_v6, %v2753_v43  ;;  %993 = vxpose.xlu2.b32.cont [15/16] (narrow) %v3258_v35, 64  ;;  %vm700_vm15 = vcmp.eq.f32.partialorder %v2872_v33, 0.0  ;;  %v1941_v10 = vpop.eup %1940  ;;  %v1179_v21 = vpop.permute.xlu1 %1178 }
 0x2aa   :  { %v714_v25 = vsel %vm712_vm2, %v3257_v2, %v711_v14  ;;  %1017 = vmatpush.msra.mxu1 %v964_v30  ;;  %v3259_v4 = vand.u32 2147483648, %v2872_v33  ;;  %v687_v17 = vsel %vm686_vm14, %v2839_v0, %v2937_v1  ;;  %v963_v18 = vmul.f32 %v1941_v10, %v2632_v22  ;;  %v3265_v14 = vld [vmem:[#allocation8_spill] sm:$0xff]  ;;  %v1236_v10 = vld [vmem:[%s3176_s4 + $0x18] sm:$0xff] }
 0x2ab   :  { %v911_v16 = vmul.f32 -1.0, %v895_v3  ;;  %v877_v52 = vsub.f32 %v714_v25, %v2753_v43  ;;  %1946 = vpow2.f32 %v933_v45  ;;  %v894_v39 = vmul.f32 %v878_v62, %v878_v62 }
 0x2ac   :  { %v702_v61 = vsel %vm700_vm15, %v3259_v4, %v699_v63  ;;  %v1943_v54 = vpop.eup %1942  ;;  %v689_v47 = vand.u32 2147483648, %v2839_v0  ;;  %vm688_vm3 = vcmp.eq.f32.partialorder %v2839_v0, 0.0  ;;  %1018 = vmatpush.msra.mxu1 %v963_v18  ;;  %v3260_v1 = vmov 0   ;;  %v1234_v4 = vld [vmem:[%s3176_s4 + $0x8] sm:$0xff] }
 0x2ad   :  { %v931_v32 = vmul.f32 1.442695, %v911_v16  ;;  %v893_v19 = vmul.f32 %v877_v52, %v877_v52  ;;  %v876_v34 = vsub.f32 %v702_v61, %v2753_v43  ;;  %v910_v58 = vmul.f32 -1.0, %v894_v39  ;;  %v1945_v59 = vpop.eup %1944  ;;  %v1235_v39 = vld [vmem:[%s3176_s4 + $0x10] sm:$0xff]  ;;  %v1233_v61 = vld [vmem:[%s3176_s4] sm:$0xff] }
 0x2ae   :  { %v962_v33 = vmul.f32 %v1943_v54, %v2662_v31  ;;  %1886 = vset.pattern.permute.xlu1 %v3260_v1  ;;  %v690_v49 = vsel %vm688_vm3, %v689_v47, %v687_v17  ;;  %v961_v41 = vmul.f32 %v1945_v59, %v2638_v29  ;;  %vm1263_vm6 = vcmask 1041408  }
 0x2af   :  { %1948 = vpow2.f32 %v931_v32  ;;  %v909_v53 = vmul.f32 -1.0, %v893_v19  ;;  %v892_v50 = vmul.f32 %v876_v34, %v876_v34  ;;  %v929_v22 = vmul.f32 1.442695, %v910_v58  ;;  %1088 = vxpose.xlu0.b32.cont [12/16] (narrow) %v3261_v51, 64 }
 0x2b0   :  { %1019 = vmatpush.msra.mxu1 %v962_v33  ;;  %v875_v0 = vsub.f32 %v690_v49, %v2753_v43  ;;  %vm1201_vm7 = vcmp.eq.s32.totalorder %v1179_v21, %v3265_v14  ;;  %vm1238_vm8 = vcmask 15360   ;;  %vm95_vm13 = vcmask 261120  }
 0x2b1   :  { %v927_v37 = vmul.f32 1.442695, %v909_v53  ;;  %v908_v5 = vmul.f32 -1.0, %v892_v50  ;;  %v1947_v11 = vpop.eup %1946  ;;  %1950 = vpow2.f32 %v929_v22  ;;  %994 = vxpose.xlu2.b32.end [16/16] (narrow) %v3262_v9, 64  ;;  %96 = vst.msk [vmem:[#allocation2] sm:$0xff] %vm95_vm13, %v3231_v38 }
 0x2b2   :  { %1020 = vmatpush.msra.mxu1 %v961_v41  ;;  %v960_v31 = vmul.f32 %v1947_v11, %v2659_v57  ;;  %v891_v40 = vmul.f32 %v875_v0, %v875_v0  ;;  %97 = vst.msk [vmem:[#allocation2 + $0x8] sm:$0xff] %vm95_vm13, %v3231_v38 }
 0x2b3   :  { %1952 = vpow2.f32 %v927_v37  ;;  %v925_v23 = vmul.f32 1.442695, %v908_v5  ;;  %98 = vst.msk [vmem:[#allocation2 + $0x10] sm:$0xff] %vm95_vm13, %v3231_v38 }
 0x2b4   :  { %1021 = vmatpush.msra.mxu1 %v960_v31  ;;  %v907_v29 = vmul.f32 -1.0, %v891_v40  ;;  %99 = vst.msk [vmem:[#allocation2 + $0x18] sm:$0xff] %vm95_vm13, %v3231_v38 }
 0x2b5   :  { %v1949_v28 = vpop.eup %1948  ;;  %1954 = vpow2.f32 %v925_v23  ;;  %100 = vst.msk [vmem:[#allocation2 + $0x20] sm:$0xff] %vm95_vm13, %v3231_v38 }
 0x2b6   :  { %v959_v55 = vmul.f32 %v1949_v28, %v2681_v24  ;;  %v923_v12 = vmul.f32 1.442695, %v907_v29  ;;  %v1237_v24 = vld [vmem:[%s3175_s3] sm:$0x3]  ;;  %101 = vst.msk [vmem:[#allocation2 + $0x28] sm:$0xff] %vm95_vm13, %v3231_v38 }
 0x2b7   :  { %v1951_v7 = vpop.eup %1950  ;;  %1089 = vxpose.xlu0.b32.cont [13/16] (narrow) %v3263_v56, 64  ;;  %1712 = vmatpush.msk.msra.mxu3 %vm1263_vm6, %v1237_v24  ;;  %102 = vst.msk [vmem:[#allocation2 + $0x30] sm:$0xff] %vm95_vm13, %v3231_v38 }
 0x2b8   :  { %1022 = vmatpush.msra.mxu1 %v959_v55  ;;  %v958_v42 = vmul.f32 %v1951_v7, %v2666_v15  ;;  %1956 = vpow2.f32 %v923_v12  ;;  %103 = vst.msk [vmem:[#allocation2 + $0x38] sm:$0xff] %vm95_vm13, %v3231_v38  ;;  %v971_v59 = vld [vmem:[#allocation2] sm:$0xff] }
 0x2b9   :  { %v1953_v43 = vpop.eup %1952  ;;  %1344 = vmatpush.msrb.mxu3 %v1236_v10  ;;  %v972_v50 = vld [vmem:[#allocation2 + $0x8] sm:$0xff] }
 0x2ba   :  { %1023 = vmatpush.msra.mxu1 %v958_v42  ;;  %v957_v44 = vmul.f32 %v1953_v43, %v2678_v46  ;;  %v1704_v46 = vsel %vm1201_vm7, 1.0, %v3231_v38  ;;  %v973_v37 = vld [vmem:[#allocation2 + $0x10] sm:$0xff] }
 0x2bb   :  { %v1955_v57 = vpop.eup %1954  ;;  %1713 = vmatmul.msk.f32.vlgmr.msra.gmra.mxu3 %vm1238_vm8, %v1704_v46  ;;  %v974_v11 = vld [vmem:[#allocation2 + $0x18] sm:$0xff] }
 0x2bc   :  { %v956_v20 = vmul.f32 %v1955_v57, %v2698_v60  ;;  %1024 = vmatpush.msra.mxu1 %v957_v44  ;;  %v1182_v60 = vpop.permute.xlu0 %1181  ;;  %1345 = vmatpush.msrb.mxu3 %v1235_v39  ;;  %v975_v40 = vld [vmem:[#allocation2 + $0x20] sm:$0xff] }
 0x2bd   :  { %vm1202_vm9 = vcmp.eq.s32.totalorder %v1182_v60, %v3265_v14  ;;  %v1185_v27 = vpop.permute.xlu1 %1184  ;;  %v976_v12 = vld [vmem:[#allocation2 + $0x28] sm:$0xff] }
 0x2be   :  { %v1957_v26 = vpop.eup %1956  ;;  %1025 = vmatpush.msra.mxu1 %v956_v20  ;;  %v1705_v13 = vsel %vm1202_vm9, 1.0, %v3231_v38  ;;  %vm1203_vm10 = vcmp.eq.s32.totalorder %v1185_v27, %v3265_v14  ;;  %1346 = vmatpush.msrb.mxu3 %v1234_v4  ;;  %v977_v56 = vld [vmem:[#allocation2 + $0x30] sm:$0xff] }
 0x2bf   :  { %v955_v15 = vmul.f32 %v1957_v26, %v2686_v8  ;;  %1090 = vxpose.xlu0.b32.cont [14/16] (narrow) %v3264_v36, 64  ;;  %v3267_v8 = vld [vmem:[#allocation27_spill] sm:$0xff]  ;;  %v1706_v6 = vsel %vm1203_vm10, 1.0, %v3231_v38  ;;  %v978_v24 = vld [vmem:[#allocation2 + $0x38] sm:$0xff] }
 0x2c0   :  { %1347 = vmatpush.msrb.mxu3 %v1233_v61 }
 0x2c1   :  { %1026 = vmatpush.msra.mxu1 %v955_v15 }
 0x2c3   :  { %1714 = vmatmul.msk.f32.gmra.mxu3 %vm1238_vm8, %v1705_v13 }
 0x2c4   :  { %v1191_v2 = vpop.permute.xlu0 %1190 }
 0x2c5   :  { %vm1205_vm12 = vcmp.eq.s32.totalorder %v1191_v2, %v3265_v14 }
 0x2c6   :  { %v1708_v35 = vsel %vm1205_vm12, 1.0, %v3231_v38 }
 0x2c7   :  { %1091 = vxpose.xlu0.b32.cont [15/16] (narrow) %v3266_v48, 64 }
 0x2cb   :  { %1715 = vmatmul.msk.f32.gmra.mxu3 %vm1238_vm8, %v1706_v6 }
 0x2cc   :  { %v1197_v19 = vpop.permute.xlu0 %1196 }
 0x2cd   :  { %vm1207_vm0 = vcmp.eq.s32.totalorder %v1197_v19, %v3265_v14 }
 0x2ce   :  { %v1710_v54 = vsel %vm1207_vm0, 1.0, %v3231_v38 }
 0x2cf   :  { %1092 = vxpose.xlu0.b32.end [16/16] (narrow) %v3267_v8, 64 }
 0x2d2   :  { %v995_v3 = vpop.trf.xlu2 }
 0x2d3   :  { %1027 = vmatmul.f32.vlgmr.msra.gmra.mxu1 %v995_v3 }
 0x2d6   :  { %v1188_v45 = vpop.permute.xlu1 %1187 }
 0x2d7   :  { %vm1204_vm11 = vcmp.eq.s32.totalorder %v1188_v45, %v3265_v14 }
 0x2d8   :  { %v1707_v62 = vsel %vm1204_vm11, 1.0, %v3231_v38 }
 0x2d9   :  { %1716 = vmatmul.msk.f32.gmra.mxu3 %vm1238_vm8, %v1707_v62  ;;  %v1892_v62 = vld [vmem:[%s3177_s5] ss:$0 sm:$0xff]  ;;  %s2008_s5 = smov [#allocation5]  }
 0x2da   :  { %v996_v30 = vpop.trf.xlu2  ;;  %s1623_s15 = sshll.u32 %s2008_s5, 4  ;;  %s1624_s15 = int_to_ptr.vmem [resolvable:$true] %s1623_s15 }
 0x2db   :  { %1030 = vmatmul.f32.gmra.mxu1 %v996_v30 }
 0x2e1   :  { %1717 = vmatmul.msk.f32.gmra.mxu3 %vm1238_vm8, %v1708_v35 }
 0x2e2   :  { %v997_v25 = vpop.trf.xlu2 }
 0x2e3   :  { %1033 = vmatmul.f32.gmra.mxu1 %v997_v25 }
 0x2ea   :  { %v998_v16 = vpop.trf.xlu2 }
 0x2eb   :  { %1036 = vmatmul.f32.gmra.mxu1 %v998_v16 }
 0x2f2   :  { %v999_v52 = vpop.trf.xlu2 }
 0x2f3   :  { %1039 = vmatmul.f32.gmra.mxu1 %v999_v52 }
 0x2fa   :  { %v1000_v63 = vpop.trf.xlu2 }
 0x2fb   :  { %1042 = vmatmul.f32.gmra.mxu1 %v1000_v63 }
 0x2fe   :  { %v1194_v18 = vpop.permute.xlu1 %1193 }
 0x2ff   :  { %vm1206_vm14 = vcmp.eq.s32.totalorder %v1194_v18, %v3265_v14 }
 0x300   :  { %v1709_v32 = vsel %vm1206_vm14, 1.0, %v3231_v38 }
 0x301   :  { %1718 = vmatmul.msk.f32.gmra.mxu3 %vm1238_vm8, %v1709_v32 }
 0x302   :  { %v1001_v17 = vpop.trf.xlu2 }
 0x303   :  { %1045 = vmatmul.f32.gmra.mxu1 %v1001_v17 }
 0x309   :  { %1719 = vmatmul.msk.f32.gmra.mxu3 %vm1238_vm8, %v1710_v54 }
 0x30a   :  { %v1002_v34 = vpop.trf.xlu2 }
 0x30b   :  { %1048 = vmatmul.f32.gmra.mxu1 %v1002_v34 }
 0x318   :  { %v1200_v47 = vpop.permute.xlu1 %1199 }
 0x319   :  { %vm1208_vm1 = vcmp.eq.s32.totalorder %v1200_v47, %v3265_v14 }
 0x31a   :  { %v1711_v58 = vsel %vm1208_vm1, 1.0, %v3231_v38 }
 0x31b   :  { %1720 = vmatmul.msk.f32.gmra.mxu3 %vm1238_vm8, %v1711_v58 }
 0x336   :  { %1887 = vset.pattern.permute.xlu0 %v3260_v1 }
 0x33e   :  { %v1284_v21 = vpop.f32.mrf.mxu3 }
 0x346   :  { %v1287_v60 = vpop.f32.mrf.mxu3 }
 0x34e   :  { %v1290_v48 = vpop.f32.mrf.mxu3 }
 0x350   :  { %v1028_v33 = vpop.f32.mrf.mxu1 }
 0x351   :  { %v1052_v53 = vadd.f32 %v1028_v33, %v971_v59 }
 0x353   :  { %1061 = vst.msk [vmem:[#allocation2] sm:$0xff] %vm95_vm13, %v1052_v53  ;;  %v1093_v53 = vpop.trf.xlu0 }
 0x354   :  { %1125 = vmatmul.f32.vlgmr.msra.gmra.mxu2 %v1093_v53  ;;  %v1075_v53 = vld [vmem:[#allocation3 + $0x30] sm:$0xff] }
 0x358   :  { %v1031_v22 = vpop.f32.mrf.mxu1 }
 0x359   :  { %v1053_v49 = vadd.f32 %v1031_v22, %v972_v50 }
 0x35a   :  { %v1225_v41 = vld [vmem:[#allocation2] sm:$0xff] }
 0x35b   :  { %1062 = vst.msk [vmem:[#allocation2 + $0x8] sm:$0xff] %vm95_vm13, %v1053_v49  ;;  %1721 = vmatmul.msk.f32.vlgmr.msrb.gmra.mxu3 %vm95_vm13, %v1225_v41 }
 0x35c   :  { %v1293_v13 = vpop.f32.mrf.mxu3 }
 0x360   :  { %v1034_v51 = vpop.f32.mrf.mxu1 }
 0x361   :  { %v1054_v5 = vadd.f32 %v1034_v51, %v973_v37  ;;  %v1094_v51 = vpop.trf.xlu0 }
 0x362   :  { %v1226_v0 = vld [vmem:[#allocation2 + $0x8] sm:$0xff]  ;;  %1128 = vmatmul.f32.gmra.mxu2 %v1094_v51  ;;  %v3268_v51 = vlaneseq }
 0x363   :  { %1063 = vst.msk [vmem:[#allocation2 + $0x10] sm:$0xff] %vm95_vm13, %v1054_v5  ;;  %1722 = vmatmul.msk.f32.gmra.mxu3 %vm95_vm13, %v1226_v0 }
 0x364   :  { %v1296_v8 = vpop.f32.mrf.mxu3 }
 0x368   :  { %v1037_v31 = vpop.f32.mrf.mxu1 }
 0x369   :  { %v1055_v9 = vadd.f32 %v1037_v31, %v974_v11 }
 0x36a   :  { %v1227_v23 = vld [vmem:[#allocation2 + $0x10] sm:$0xff] }
 0x36b   :  { %1064 = vst.msk [vmem:[#allocation2 + $0x18] sm:$0xff] %vm95_vm13, %v1055_v9  ;;  %1723 = vmatmul.msk.f32.gmra.mxu3 %vm95_vm13, %v1227_v23  ;;  %v1095_v23 = vpop.trf.xlu0 }
 0x36c   :  { %1131 = vmatmul.f32.gmra.mxu2 %v1095_v23 }
 0x370   :  { %v1040_v28 = vpop.f32.mrf.mxu1 }
 0x371   :  { %v1056_v29 = vadd.f32 %v1040_v28, %v975_v40 }
 0x372   :  { %v1228_v55 = vld [vmem:[#allocation2 + $0x18] sm:$0xff] }
 0x373   :  { %1065 = vst.msk [vmem:[#allocation2 + $0x20] sm:$0xff] %vm95_vm13, %v1056_v29  ;;  %1724 = vmatmul.msk.f32.gmra.mxu3 %vm95_vm13, %v1228_v55 }
 0x378   :  { %v1043_v7 = vpop.f32.mrf.mxu1 }
 0x379   :  { %v1057_v43 = vadd.f32 %v1043_v7, %v976_v12  ;;  %v1096_v7 = vpop.trf.xlu0 }
 0x37a   :  { %v1229_v42 = vld [vmem:[#allocation2 + $0x20] sm:$0xff]  ;;  %1134 = vmatmul.f32.gmra.mxu2 %v1096_v7 }
 0x37b   :  { %1066 = vst.msk [vmem:[#allocation2 + $0x28] sm:$0xff] %vm95_vm13, %v1057_v43  ;;  %1725 = vmatmul.msk.f32.gmra.mxu3 %vm95_vm13, %v1229_v42 }
 0x380   :  { %v1046_v57 = vpop.f32.mrf.mxu1 }
 0x381   :  { %v1058_v44 = vadd.f32 %v1046_v57, %v977_v56  ;;  %v1097_v57 = vpop.trf.xlu0 }
 0x382   :  { %v1230_v20 = vld [vmem:[#allocation2 + $0x28] sm:$0xff]  ;;  %1137 = vmatmul.f32.gmra.mxu2 %v1097_v57 }
 0x383   :  { %1067 = vst.msk [vmem:[#allocation2 + $0x30] sm:$0xff] %vm95_vm13, %v1058_v44  ;;  %1726 = vmatmul.msk.f32.gmra.mxu3 %vm95_vm13, %v1230_v20 }
 0x384   :  { %v1299_v3 = vpop.f32.mrf.mxu3 }
 0x388   :  { %v1049_v26 = vpop.f32.mrf.mxu1 }
 0x389   :  { %v1059_v15 = vadd.f32 %v1049_v26, %v978_v24  ;;  %v1098_v44 = vpop.trf.xlu0  ;;  %v1893_v26 = vld [vmem:[#allocation4] ss:$0 sm:$0xff] }
 0x38a   :  { %v1231_v36 = vld [vmem:[#allocation2 + $0x30] sm:$0xff]  ;;  %1140 = vmatmul.f32.gmra.mxu2 %v1098_v44 }
 0x38b   :  { %1068 = vst.msk [vmem:[#allocation2 + $0x38] sm:$0xff] %vm95_vm13, %v1059_v15  ;;  %1727 = vmatmul.msk.f32.gmra.mxu3 %vm95_vm13, %v1231_v36 }
 0x38c   :  { %v1302_v27 = vpop.f32.mrf.mxu3 }
 0x391   :  { %v1099_v20 = vpop.trf.xlu0 }
 0x392   :  { %v1232_v46 = vld [vmem:[#allocation2 + $0x38] sm:$0xff]  ;;  %1143 = vmatmul.f32.gmra.mxu2 %v1099_v20 }
 0x393   :  { %1728 = vmatmul.msk.f32.gmra.mxu3 %vm95_vm13, %v1232_v46 }
 0x399   :  { %v1100_v24 = vpop.trf.xlu0 }
 0x39a   :  { %1146 = vmatmul.f32.gmra.mxu2 %v1100_v24 }
 0x39e   :  { %v1305_v6 = vpop.f32.mrf.mxu3 }
 0x3de   :  { %v1349_v30 = vpop.f32.mrf.mxu3 }
 0x3df   :  { %v1350_v45 = vadd.f32 %v1349_v30, %v1284_v21  ;;  %v1069_v30 = vld [vmem:[#allocation3] sm:$0xff] }
 0x3e1   :  { %1958 = vtanh.f32 %v1350_v45  ;;  %v1126_v45 = vpop.f32.mrf.mxu2 }
 0x3e6   :  { %v1352_v2 = vpop.f32.mrf.mxu3 }
 0x3e7   :  { %v1959_v25 = vpop.eup %1958  ;;  %v1353_v35 = vadd.f32 %v1352_v2, %v1287_v60 }
 0x3e8   :  { %v1385_v16 = vmul.f32 %v1959_v25, %v1892_v62 }
 0x3e9   :  { %1960 = vtanh.f32 %v1353_v35 }
 0x3ea   :  { %v1393_v52 = vsel %vm95_vm13, %v1385_v16, 0.0  ;;  %v1070_v16 = vld [vmem:[#allocation3 + $0x8] sm:$0xff] }
 0x3eb   :  { %1394 = vadd.xlane.f32.xlu1 %v1393_v52  ;;  %v1129_v52 = vpop.f32.mrf.mxu2 }
 0x3ee   :  { %v1355_v63 = vpop.f32.mrf.mxu3 }
 0x3ef   :  { %v1961_v10 = vpop.eup %1960  ;;  %v1356_v39 = vadd.f32 %v1355_v63, %v1290_v48  ;;  %v1151_v63 = vadd.f32 %v1129_v52, %v1070_v16 }
 0x3f0   :  { %v1386_v4 = vmul.f32 %v1961_v10, %v1892_v62 }
 0x3f1   :  { %1962 = vtanh.f32 %v1356_v39  ;;  %1159 = vst.msk [vmem:[#allocation3 + $0x8] sm:$0xff] %vm104_vm4, %v1151_v63  ;;  %v1071_v39 = vld [vmem:[#allocation3 + $0x10] sm:$0xff] }
 0x3f2   :  { %v1396_v61 = vsel %vm95_vm13, %v1386_v4, 0.0 }
 0x3f3   :  { %1397 = vadd.xlane.f32.xlu1 %v1396_v61  ;;  %v1132_v4 = vpop.f32.mrf.mxu2 }
 0x3f4   :  { %v1152_v61 = vadd.f32 %v1132_v4, %v1071_v39 }
 0x3f6   :  { %v1358_v17 = vpop.f32.mrf.mxu3  ;;  %1160 = vst.msk [vmem:[#allocation3 + $0x10] sm:$0xff] %vm104_vm4, %v1152_v61 }
 0x3f7   :  { %v1963_v18 = vpop.eup %1962  ;;  %v1359_v32 = vadd.f32 %v1358_v17, %v1293_v13 }
 0x3f8   :  { %v1387_v19 = vmul.f32 %v1963_v18, %v1892_v62  ;;  %v1072_v18 = vld [vmem:[#allocation3 + $0x18] sm:$0xff] }
 0x3f9   :  { %1964 = vtanh.f32 %v1359_v32 }
 0x3fa   :  { %v1399_v34 = vsel %vm95_vm13, %v1387_v19, 0.0 }
 0x3fb   :  { %1400 = vadd.xlane.f32.xlu1 %v1399_v34  ;;  %v1073_v34 = vld [vmem:[#allocation3 + $0x20] sm:$0xff] }
 0x3fd   :  { %v1135_v32 = vpop.f32.mrf.mxu2  ;;  %v1431_v63 = vld [vmem:[#allocation3 + $0x10] sm:$0xff] }
 0x3fe   :  { %v1361_v54 = vpop.f32.mrf.mxu3  ;;  %v1153_v19 = vadd.f32 %v1135_v32, %v1072_v18 }
 0x3ff   :  { %v1965_v47 = vpop.eup %1964  ;;  %v1362_v58 = vadd.f32 %v1361_v54, %v1296_v8 }
 0x400   :  { %v1388_v59 = vmul.f32 %v1965_v47, %v1892_v62  ;;  %1161 = vst.msk [vmem:[#allocation3 + $0x18] sm:$0xff] %vm104_vm4, %v1153_v19 }
 0x401   :  { %1966 = vtanh.f32 %v1362_v58  ;;  %v1074_v58 = vld [vmem:[#allocation3 + $0x28] sm:$0xff] }
 0x402   :  { %v1402_v33 = vsel %vm95_vm13, %v1388_v59, 0.0 }
 0x403   :  { %1403 = vadd.xlane.f32.xlu1 %v1402_v33 }
 0x405   :  { %v1138_v54 = vpop.f32.mrf.mxu2 }
 0x406   :  { %v1364_v50 = vpop.f32.mrf.mxu3  ;;  %v1154_v47 = vadd.f32 %v1138_v54, %v1073_v34  ;;  %v2007_v54 = vmov 2  }
 0x407   :  { %v1967_v22 = vpop.eup %1966  ;;  %v1365_v49 = vadd.f32 %v1364_v50, %v1299_v3 }
 0x408   :  { %v1389_v41 = vmul.f32 %v1967_v22, %v1892_v62  ;;  %1162 = vst.msk [vmem:[#allocation3 + $0x20] sm:$0xff] %vm104_vm4, %v1154_v47 }
 0x409   :  { %1968 = vtanh.f32 %v1365_v49  ;;  %v1076_v49 = vld [vmem:[#allocation3 + $0x38] sm:$0xff] }
 0x40a   :  { %v1405_v37 = vsel %vm95_vm13, %v1389_v41, 0.0 }
 0x40b   :  { %1406 = vadd.xlane.f32.xlu1 %v1405_v37 }
 0x40d   :  { %v1141_v59 = vpop.f32.mrf.mxu2 }
 0x40e   :  { %v1367_v5 = vpop.f32.mrf.mxu3  ;;  %v1155_v33 = vadd.f32 %v1141_v59, %v1074_v58  ;;  %v3269_v59 = vmov 1  }
 0x40f   :  { %v1969_v0 = vpop.eup %1968  ;;  %v1368_v11 = vadd.f32 %v1367_v5, %v1302_v27  ;;  %v1486_v5 = vshrl.u32 %v3268_v51, 7 }
 0x410   :  { %v1390_v31 = vmul.f32 %v1969_v0, %v1892_v62  ;;  %1163 = vst.msk [vmem:[#allocation3 + $0x28] sm:$0xff] %vm104_vm4, %v1155_v33  ;;  %v3145_v0 = vmul.u32 8, %v3265_v14 }
 0x411   :  { %1970 = vtanh.f32 %v1368_v11  ;;  %v1490_v57 = vadd.s32 32, %v1486_v5 }
 0x412   :  { %v1408_v9 = vsel %vm95_vm13, %v1390_v31, 0.0  ;;  %v1495_v11 = vsub.s32 %v1486_v5, %v3145_v0  ;;  %v1487_v31 = vadd.s32 8, %v1486_v5 }
 0x413   :  { %1409 = vadd.xlane.f32.xlu1 %v1408_v9  ;;  %v1499_v20 = vsub.s32 %v1490_v57, %v3145_v0 }
 0x414   :  { %vm1503_vm2 = vcmp.ge.s32.totalorder %v1495_v11, 0  ;;  %vm1511_vm15 = vcmp.lt.s32.totalorder %v1495_v11, 8  ;;  %v1496_v9 = vsub.s32 %v1487_v31, %v3145_v0 }
 0x415   :  { %v1144_v50 = vpop.f32.mrf.mxu2  ;;  %vm1519_vm3 = vmand %vm1503_vm2, %vm1511_vm15  ;;  %vm1507_vm14 = vcmp.ge.s32.totalorder %v1499_v20, 0  ;;  %vm1515_vm0 = vcmp.lt.s32.totalorder %v1499_v20, 8 }
 0x416   :  { %v1370_v40 = vpop.f32.mrf.mxu3  ;;  %v1156_v22 = vadd.f32 %v1144_v50, %v1075_v53  ;;  %v1729_v23 = vsel %vm1519_vm3, 1.0, %v3231_v38  ;;  %vm1504_vm6 = vcmp.ge.s32.totalorder %v1496_v9, 0  ;;  %vm1512_vm7 = vcmp.lt.s32.totalorder %v1496_v9, 8  ;;  %vm1523_vm1 = vmand %vm1507_vm14, %vm1515_vm0 }
 0x417   :  { %v1971_v28 = vpop.eup %1970  ;;  %v1371_v29 = vadd.f32 %v1370_v40, %v1305_v6  ;;  %v1488_v40 = vadd.s32 16, %v1486_v5 }
 0x418   :  { %v1391_v55 = vmul.f32 %v1971_v28, %v1892_v62  ;;  %1164 = vst.msk [vmem:[#allocation3 + $0x30] sm:$0xff] %vm104_vm4, %v1156_v22 }
 0x419   :  { %1972 = vtanh.f32 %v1371_v29  ;;  %v1497_v29 = vsub.s32 %v1488_v40, %v3145_v0 }
 0x41a   :  { %v1411_v12 = vsel %vm95_vm13, %v1391_v55, 0.0 }
 0x41b   :  { %1412 = vadd.xlane.f32.xlu1 %v1411_v12  ;;  %vm1505_vm8 = vcmp.ge.s32.totalorder %v1497_v29, 0  ;;  %vm1513_vm9 = vcmp.lt.s32.totalorder %v1497_v29, 8 }
 0x41c   :  { %vm1521_vm10 = vmand %vm1505_vm8, %vm1513_vm9 }
 0x41d   :  { %v1147_v41 = vpop.f32.mrf.mxu2 }
 0x41e   :  { %v1157_v37 = vadd.f32 %v1147_v41, %v1076_v49 }
 0x41f   :  { %v1973_v43 = vpop.eup %1972  ;;  %v1435_v44 = vld [vmem:[#allocation3 + $0x30] sm:$0xff] }
 0x420   :  { %v1392_v42 = vmul.f32 %v1973_v43, %v1892_v62  ;;  %v1150_v62 = vadd.f32 %v1126_v45, %v1069_v30  ;;  %1165 = vst.msk [vmem:[#allocation3 + $0x38] sm:$0xff] %vm104_vm4, %v1157_v37  ;;  %v1489_v43 = vadd.s32 24, %v1486_v5 }
 0x422   :  { %v1414_v56 = vsel %vm95_vm13, %v1392_v42, 0.0  ;;  %1158 = vst.msk [vmem:[#allocation3] sm:$0xff] %vm104_vm4, %v1150_v62  ;;  %vm1520_vm4 = vmand %vm1504_vm6, %vm1512_vm7  ;;  %v1498_v42 = vsub.s32 %v1489_v43, %v3145_v0  ;;  %v1493_v62 = vadd.s32 56, %v1486_v5 }
 0x423   :  { %1415 = vadd.xlane.f32.xlu1 %v1414_v56  ;;  %v1730_v12 = vsel %vm1520_vm4, 1.0, %v3231_v38  ;;  %v1731_v56 = vsel %vm1521_vm10, 1.0, %v3231_v38 }
 0x424   :  { %vm1506_vm11 = vcmp.ge.s32.totalorder %v1498_v42, 0  ;;  %vm1514_vm12 = vcmp.lt.s32.totalorder %v1498_v42, 8 }
 0x425   :  { %vm1522_vm13 = vmand %vm1506_vm11, %vm1514_vm12  ;;  %vm1600_vm11 = vcmp.eq.s32.totalorder %v3265_v14, 2  ;;  %vm1599_vm12 = vcmp.eq.s32.totalorder %v3265_v14, 1 }
 0x427   :  { %v1436_v28 = vld [vmem:[#allocation3 + $0x38] sm:$0xff] }
 0x429   :  { %v1429_v32 = vld [vmem:[#allocation3] sm:$0xff] }
 0x45e   :  { %v1395_v15 = vpop.xlane.xlu1 %1394 }
 0x45f   :  { %v1421_v36 = vadd.f32 %v1893_v26, %v1395_v15 }
 0x466   :  { %v1398_v21 = vpop.xlane.xlu1 %1397 }
 0x467   :  { %v1422_v46 = vadd.f32 %v1893_v26, %v1398_v21  ;;  %v1434_v21 = vld [vmem:[#allocation3 + $0x28] sm:$0xff] }
 0x469   :  { %1444 = vperm.xlu0 %1887, %v1422_v46  }
 0x46e   :  { %v1401_v60 = vpop.xlane.xlu1 %1400 }
 0x46f   :  { %v1423_v48 = vadd.f32 %v1893_v26, %v1401_v60 }
 0x476   :  { %v1404_v13 = vpop.xlane.xlu1 %1403 }
 0x477   :  { %v1424_v17 = vadd.f32 %v1893_v26, %v1404_v13 }
 0x47e   :  { %v1407_v8 = vpop.xlane.xlu1 %1406 }
 0x47f   :  { %v1425_v10 = vadd.f32 %v1893_v26, %v1407_v8  ;;  %v1492_v8 = vadd.s32 48, %v1486_v5 }
 0x486   :  { %v1410_v3 = vpop.xlane.xlu1 %1409 }
 0x487   :  { %v1426_v25 = vadd.f32 %v1893_v26, %v1410_v3  ;;  %v1433_v3 = vld [vmem:[#allocation3 + $0x20] sm:$0xff] }
 0x48e   :  { %v1413_v27 = vpop.xlane.xlu1 %1412 }
 0x48f   :  { %v1427_v6 = vadd.f32 %v1893_v26, %v1413_v27  ;;  %v1501_v27 = vsub.s32 %v1492_v8, %v3145_v0 }
 0x491   :  { %1469 = vperm.xlu1 %1886, %v1427_v6   ;;  %vm1509_vm6 = vcmp.ge.s32.totalorder %v1501_v27, 0  ;;  %vm1517_vm7 = vcmp.lt.s32.totalorder %v1501_v27, 8 }
 0x492   :  { %vm1525_vm4 = vmand %vm1509_vm6, %vm1517_vm7 }
 0x493   :  { %v1735_v16 = vsel %vm1525_vm4, 1.0, %v3231_v38 }
 0x496   :  { %v1416_v2 = vpop.xlane.xlu1 %1415 }
 0x497   :  { %v1428_v35 = vadd.f32 %v1893_v26, %v1416_v2  ;;  %v1732_v26 = vsel %vm1522_vm13, 1.0, %v3231_v38  ;;  %v1432_v2 = vld [vmem:[#allocation3 + $0x18] sm:$0xff] }
 0x499   :  { %1464 = vperm.xlu1 %1886, %v1426_v25   ;;  %1474 = vperm.xlu2 %1883, %v1428_v35   ;;  %v1502_v25 = vsub.s32 %v1493_v62, %v3145_v0 }
 0x49b   :  { %vm1510_vm8 = vcmp.ge.s32.totalorder %v1502_v25, 0  ;;  %vm1518_vm9 = vcmp.lt.s32.totalorder %v1502_v25, 8 }
 0x49c   :  { %vm1526_vm10 = vmand %vm1510_vm8, %vm1518_vm9 }
 0x49d   :  { %v1736_v61 = vsel %vm1526_vm10, 1.0, %v3231_v38 }
 0x4a1   :  { %1459 = vperm.xlu1 %1886, %v1425_v10   ;;  %v1430_v10 = vld [vmem:[#allocation3 + $0x8] sm:$0xff]  ;;  %1888 = vset.pattern.permute.xlu2 %v2007_v54 }
 0x4a9   :  { %1454 = vperm.xlu1 %1886, %v1424_v17  }
 0x4b1   :  { %1449 = vperm.xlu1 %1886, %v1423_v48   ;;  %v1733_v48 = vsel %vm1523_vm1, 1.0, %v3231_v38 }
 0x4b9   :  { %1439 = vperm.xlu1 %1886, %v1421_v36   ;;  %v1491_v36 = vadd.s32 40, %v1486_v5 }
 0x4bb   :  { %v1500_v46 = vsub.s32 %v1491_v36, %v3145_v0 }
 0x4bd   :  { %vm1508_vm2 = vcmp.ge.s32.totalorder %v1500_v46, 0  ;;  %vm1516_vm15 = vcmp.lt.s32.totalorder %v1500_v46, 8 }
 0x4be   :  { %vm1524_vm3 = vmand %vm1508_vm2, %vm1516_vm15 }
 0x4bf   :  { %v1734_v30 = vsel %vm1524_vm3, 1.0, %v3231_v38 }
 0x4db   :  { %v1445_v39 = vpop.permute.xlu0 %1444 }
 0x4dc   :  { %v1478_v18 = vmul.f32 %v1445_v39, %v1430_v10 }
 0x4ee   :  { %1543 = vxpose.xlu1.b32.start [1/8] (short) (narrow) %v1729_v23, 8 }
 0x4f3   :  { %v1475_v55 = vpop.permute.xlu2 %1474 }
 0x4f4   :  { %v1484_v7 = vmul.f32 %v1475_v55, %v1436_v28 }
 0x4f6   :  { %1544 = vxpose.xlu1.b32.cont [2/8] (short) (narrow) %v1730_v12, 8  ;;  %1586 = vmatpush.msrb.mxu1 %v1484_v7 }
 0x4fe   :  { %1545 = vxpose.xlu1.b32.cont [3/8] (short) (narrow) %v1731_v56, 8 }
 0x503   :  { %v1470_v24 = vpop.permute.xlu1 %1469 }
 0x504   :  { %v1483_v15 = vmul.f32 %v1470_v24, %v1435_v44 }
 0x506   :  { %1546 = vxpose.xlu1.b32.cont [4/8] (short) (narrow) %v1732_v26, 8  ;;  %1587 = vmatpush.msrb.mxu1 %v1483_v15 }
 0x50b   :  { %v1465_v60 = vpop.permute.xlu1 %1464 }
 0x50c   :  { %v1482_v13 = vmul.f32 %v1465_v60, %v1434_v21 }
 0x50e   :  { %1547 = vxpose.xlu1.b32.cont [5/8] (short) (narrow) %v1733_v48, 8  ;;  %1588 = vmatpush.msrb.mxu1 %v1482_v13 }
 0x513   :  { %v1460_v6 = vpop.permute.xlu1 %1459 }
 0x514   :  { %v1481_v45 = vmul.f32 %v1460_v6, %v1433_v3 }
 0x516   :  { %1548 = vxpose.xlu1.b32.cont [6/8] (short) (narrow) %v1734_v30, 8  ;;  %1589 = vmatpush.msrb.mxu1 %v1481_v45 }
 0x51b   :  { %v1455_v35 = vpop.permute.xlu1 %1454 }
 0x51c   :  { %v1480_v52 = vmul.f32 %v1455_v35, %v1432_v2 }
 0x51e   :  { %1549 = vxpose.xlu1.b32.cont [7/8] (short) (narrow) %v1735_v16, 8  ;;  %1590 = vmatpush.msrb.mxu1 %v1480_v52 }
 0x523   :  { %v1450_v4 = vpop.permute.xlu1 %1449 }
 0x524   :  { %v1479_v17 = vmul.f32 %v1450_v4, %v1431_v63 }
 0x526   :  { %1550 = vxpose.xlu1.b32.end [8/8] (short) (narrow) %v1736_v61, 8  ;;  %1591 = vmatpush.msrb.mxu1 %v1479_v17 }
 0x528   :  { %1592 = vmatpush.msrb.mxu1 %v1478_v18 }
 0x52b   :  { %v1440_v19 = vpop.permute.xlu1 %1439 }
 0x52c   :  { %v1477_v34 = vmul.f32 %v1440_v19, %v1429_v32 }
 0x52e   :  { %1593 = vmatpush.msrb.mxu1 %v1477_v34 }
 0x592   :  { %v1559_v47 = vpop.trf.xlu1 }
 0x593   :  { %1737 = vmatmul.msk.f32.vlgmr.msrb.gmra.mxu1 %vm484_vm5, %v1559_v47  ;;  %vm1598_vm5 = vcmp.eq.s32.totalorder %v3265_v14, 0 }
 0x610   :  { %v1595_v58 = vpop.f32.mrf.mxu1 }
 0x611   :  { %1603 = vperm.xlu2 %1888, %v1595_v58  }
 0x619   :  { %1889 = vset.pattern.permute.xlu2 %v3269_v59 }
 0x61a   :  { %1608 = vperm.xlu2 %1889, %v1595_v58  }
 0x622   :  { %1890 = vset.pattern.permute.xlu2 %v3260_v1 }
 0x623   :  { %1613 = vperm.xlu2 %1890, %v1595_v58  }
 0x66b   :  { %v1604_v38 = vpop.permute.xlu2 %1603 }
 0x66c   :  { %v1606_v53 = vsel %vm1600_vm11, %v1604_v38, 0.0 }
 0x674   :  { %v1609_v33 = vpop.permute.xlu2 %1608 }
 0x675   :  { %v1611_v50 = vsel %vm1599_vm12, %v1609_v33, %v1606_v53 }
 0x67d   :  { %v1614_v22 = vpop.permute.xlu2 %1613 }
 0x67e   :  { %v1616_v1 = vsel %vm1598_vm5, %v1614_v22, %v1611_v50 }
 0x67f   :  { %1617 = vst [vmem:[#allocation5] sm:$0xff] %v1616_v1 }
 0x680   :  { %1628 = dma.vmem_to_hbm [thread:$0]  %s1624_s15, 128, %s1626_s18, [#allocation6]  }
 0x681   :  { %2000 = dma.done.wait [#allocation6], 128  }
 0x682   :  { %2001 = vsyncadd [#allocation6], 4294967168 }
 0x683   :  { %1633 = vsyncpa [#allocation6], 1 }

</bundles_post_ra>
